<compile_context>
chip_gen: v7x
topology: tpu7x:2x2x1
jax: 0.10.0
libtpu: 0.0.40
codegen_flags: <defaults>
</compile_context>

<pallas_src>
import functools

import jax
import jax.numpy as jnp
from jax import lax
from jax.experimental import pallas as pl
from jax.experimental.pallas import tpu as pltpu

BN_EPS = 1e-5


def _pick_tile_h(Ho, Wo, target_rows=512):
    """Largest divisor th of Ho with th*Wo <= target_rows and th*Wo % 8 == 0."""
    best = None
    for th in range(1, Ho + 1):
        if Ho % th:
            continue
        rows = th * Wo
        if rows > target_rows:
            break
        if rows % 8 == 0:
            best = th
    # Fallback: whole image (block == full array dims, always a legal BlockSpec).
    return best if best is not None else Ho


def _conv_stats_kernel(x_ref, w_ref, y_ref, stats_ref, *,
                       th, Wo, KH, KW, C_in, stride, dilation):
    """Phase 1: ReLU + conv (in-VMEM im2col matmul) + per-tile BN partial sums.

    x_ref:     [Hp, Wp, C_in]   one padded NHWC image (resident across h-tiles)
    w_ref:     [K,  C_out_p]    conv weight, channel-padded to 128 lanes
    y_ref:     [tm, C_out_p]    pre-BN conv output tile (tm = th*Wo rows)
    stats_ref: [2,  C_out_p]    per-tile [sum(y); sum(y*y)] over the tm rows
    """
    i = pl.program_id(1)                                   # h-tile within image
    win_h = (th - 1) * stride + (KH - 1) * dilation + 1
    row0 = i * (th * stride)

    # One dynamic-offset window load; ReLU applied once (not per duplicated tap).
    xw = jnp.maximum(x_ref[pl.ds(row0, win_h), :, :], 0.0)  # [win_h, Wp, C_in]

    # Build the (tm, K) im2col tile in VMEM with static tap slices (no HBM im2col).
    tm = th * Wo
    taps = []
    for kh in range(KH):
        for kw in range(KW):
            r0 = kh * dilation
            c0 = kw * dilation
            t = xw[r0:r0 + (th - 1) * stride + 1:stride,
                   c0:c0 + (Wo - 1) * stride + 1:stride, :]  # [th, Wo, C_in]
            taps.append(t.reshape(tm, C_in))
    a = jnp.concatenate(taps, axis=1)                        # [tm, K]

    # Single MXU matmul for the whole tile (K and C_out are small; MXU pads them).
    y = jnp.dot(a, w_ref[...], preferred_element_type=jnp.float32)  # [tm, C_out_p]
    y_ref[...] = y

    # Single-pass BN partial statistics (sum, sum of squares) per channel.
    s = jnp.sum(y, axis=0, keepdims=True)
    sq = jnp.sum(y * y, axis=0, keepdims=True)
    stats_ref[...] = jnp.concatenate([s, sq], axis=0)


def _bn_apply_kernel(y_ref, scale_ref, shift_ref, o_ref):
    """Phase 2: lane-dense FMA  out = y * scale + shift  (BN folded into scale/shift)."""
    o_ref[...] = y_ref[...] * scale_ref[...] + shift_ref[...]


def relu_conv_bn(x_nchw, weight, gamma, beta, *, stride, padding, dilation):
    """x_nchw: [N, C_in, H, W] f32.  weight: [C_out, C_in, KH, KW].  Returns NCHW."""
    N, C_in, H, W = x_nchw.shape
    C_out, _, KH, KW = weight.shape

    # NCHW -> NHWC + spatial zero-pad.  ReLU(0) == 0, so padding before the
    # in-kernel ReLU matches PyTorch's ReLU -> Conv2d(padding=...) exactly.
    x = jnp.transpose(x_nchw, (0, 2, 3, 1)).astype(jnp.float32)
    x_pad = jnp.pad(x, ((0, 0), (padding, padding), (padding, padding), (0, 0)))

    Hp, Wp = H + 2 * padding, W + 2 * padding
    Ho = (Hp - dilation * (KH - 1) - 1) // stride + 1
    Wo = (Wp - dilation * (KW - 1) - 1) // stride + 1
    K = KH * KW * C_in
    C_out_p = ((C_out + 127) // 128) * 128       # lane-dense channel width

    # Conv weight -> [K, C_out], tap-major / C_in-minor rows, then pad channels.
    Wm = jnp.transpose(weight, (2, 3, 1, 0)).reshape(K, C_out).astype(jnp.float32)
    Wm_p = jnp.pad(Wm, ((0, 0), (0, C_out_p - C_out)))
    gamma_p = jnp.pad(gamma.astype(jnp.float32), (0, C_out_p - C_out), constant_values=1.0)
    beta_p = jnp.pad(beta.astype(jnp.float32), (0, C_out_p - C_out))

    th = _pick_tile_h(Ho, Wo)
    n_ht = Ho // th
    tm = th * Wo

    cparams = pltpu.CompilerParams(
        dimension_semantics=("parallel", "parallel"),
        vmem_limit_bytes=32 * 1024 * 1024)

    # ---- phase 1: conv tiles + per-tile BN partial stats ---------------------
    kernel1 = functools.partial(
        _conv_stats_kernel, th=th, Wo=Wo, KH=KH, KW=KW, C_in=C_in,
        stride=stride, dilation=dilation)

    y, stats = pl.pallas_call(
        kernel1,
        grid=(N, n_ht),
        in_specs=[
            # One padded image, resident across the inner h-tile axis.
            pl.BlockSpec((None, Hp, Wp, C_in), lambda n, i: (n, 0, 0, 0)),
            # Weights: constant block index -> DMA'd once, stays in VMEM.
            pl.BlockSpec((K, C_out_p), lambda n, i: (0, 0)),
        ],
        out_specs=[
            pl.BlockSpec((None, tm, C_out_p), lambda n, i: (n, i, 0)),
            pl.BlockSpec((None, None, 2, C_out_p), lambda n, i: (n, i, 0, 0)),
        ],
        out_shape=[
            jax.ShapeDtypeStruct((N, Ho * Wo, C_out_p), jnp.float32),
            jax.ShapeDtypeStruct((N, n_ht, 2, C_out_p), jnp.float32),
        ],
        compiler_params=cparams,
    )(x_pad, Wm_p)

    # ---- finalize BN stats (tiny) and fold gamma/beta into scale/shift -------
    # Single-pass variance (E[y^2] - mean^2) with f32 accumulation; clamped >= 0.
    s = jnp.sum(stats, axis=(0, 1))                       # [2, C_out_p]
    count = jnp.float32(N * Ho * Wo)
    mean = s[0] / count
    var = jnp.maximum(s[1] / count - mean * mean, 0.0)
    inv = lax.rsqrt(var + BN_EPS)
    scale = (gamma_p * inv).reshape(1, C_out_p)
    shift = (beta_p - mean * gamma_p * inv).reshape(1, C_out_p)
    # TODO(synk): PyTorch training-mode BatchNorm2d also updates running_mean /
    # running_var buffers; the forward output here uses batch stats only.

    # ---- phase 2: normalize tiles in place (lane-dense, aliased) -------------
    out = pl.pallas_call(
        _bn_apply_kernel,
        grid=(N, n_ht),
        in_specs=[
            pl.BlockSpec((None, tm, C_out_p), lambda n, i: (n, i, 0)),
            pl.BlockSpec((1, C_out_p), lambda n, i: (0, 0)),
            pl.BlockSpec((1, C_out_p), lambda n, i: (0, 0)),
        ],
        out_specs=pl.BlockSpec((None, tm, C_out_p), lambda n, i: (n, i, 0)),
        out_shape=jax.ShapeDtypeStruct((N, Ho * Wo, C_out_p), jnp.float32),
        input_output_aliases={0: 0},
        compiler_params=cparams,
    )(y, scale, shift)

    out = out[:, :, :C_out].reshape(N, Ho, Wo, C_out)
    return jnp.transpose(out, (0, 3, 1, 2))               # NCHW, matching PyTorch


def _reference(x, w, gamma, beta, stride, padding, dilation):
    """Pure-JAX ReLU -> Conv2d(no bias) -> BatchNorm2d(train) for self-checking."""
    xr = jnp.maximum(x, 0.0)
    y = lax.conv_general_dilated(
        xr, w, window_strides=(stride, stride),
        padding=((padding, padding), (padding, padding)),
        rhs_dilation=(dilation, dilation),
        dimension_numbers=("NCHW", "OIHW", "NCHW"),
        precision=lax.Precision.HIGHEST)
    mean = jnp.mean(y, axis=(0, 2, 3), keepdims=True)
    var = jnp.mean((y - mean) ** 2, axis=(0, 2, 3), keepdims=True)
    g = gamma.reshape(1, -1, 1, 1)
    b = beta.reshape(1, -1, 1, 1)
    return (y - mean) * lax.rsqrt(var + BN_EPS) * g + b


if __name__ == "__main__":
    # ReLUConvBN(C_in=4, C_out=8, kernel_size=3, stride=1, padding=1,
    #            dilation=1, affine=True)
    N, C_in, H, W = 2, 4, 16, 16
    C_out, KH, KW = 8, 3, 3
    stride, padding, dilation = 1, 1, 1

    key = jax.random.PRNGKey(0)
    kx, kw = jax.random.split(key)

    x = jax.random.normal(kx, (N, C_in, H, W), dtype=jnp.float32)
    fan_in = C_in * KH * KW
    weight = jax.random.normal(kw, (C_out, C_in, KH, KW), dtype=jnp.float32) * (2.0 / fan_in) ** 0.5
    gamma = jnp.ones((C_out,), dtype=jnp.float32)   # BN affine init (PyTorch)
    beta = jnp.zeros((C_out,), dtype=jnp.float32)

    fn = jax.jit(functools.partial(relu_conv_bn, stride=stride,
                                   padding=padding, dilation=dilation))
    y = fn(x, weight, gamma, beta)
    jax.block_until_ready(y)

    assert y.shape == (N, C_out, H, W), y.shape
    assert y.dtype == jnp.float32

    y_ref = _reference(x, weight, gamma, beta, stride, padding, dilation)
    max_err = float(jnp.max(jnp.abs(y - y_ref)))
    assert max_err < 5e-2, f"max abs error vs reference: {max_err}"

    print("KERNEL_OK")
</pallas_src>

<mosaic_0001>
module attributes {stable_mosaic.version = 11 : i64} {
  func.func @_conv_stats_kernel(%arg0: i32, %arg1: i32, %arg2: memref<1x18x18x4xf32, #tpu.memory_space<vmem>>, %arg3: memref<36x128xf32, #tpu.memory_space<vmem>>, %arg4: memref<1x256x128xf32, #tpu.memory_space<vmem>>, %arg5: memref<1x1x2x128xf32, #tpu.memory_space<vmem>>) attributes {dimension_semantics = [#tpu.dimension_semantics<parallel>, #tpu.dimension_semantics<parallel>], iteration_bounds = array<i64: 2, 1>, scalar_prefetch = 0 : i64, scratch_operands = 0 : i64, tpu.core_type = #tpu.core_type<tc>, window_params = [{transform_indices = @transform_0, window_bounds = array<i64: 1, 18, 18, 4>}, {pipeline_mode = #tpu.pipeline_mode<synchronous>, transform_indices = @transform_1, window_bounds = array<i64: 36, 128>}, {transform_indices = @transform_2, window_bounds = array<i64: 1, 256, 128>}, {transform_indices = @transform_3, window_bounds = array<i64: 1, 1, 2, 128>}]} {
    %c16_i32 = arith.constant 16 : i32
    %0 = arith.muli %arg1, %c16_i32 : i32
    %c0 = arith.constant 0 : index
    %1 = arith.index_cast %0 : i32 to index
    %c0_0 = arith.constant 0 : index
    %c0_1 = arith.constant 0 : index
    %2 = vector.load %arg2[%c0, %1, %c0_0, %c0_1] : memref<1x18x18x4xf32, #tpu.memory_space<vmem>>, vector<1x18x18x4xf32>
    %3 = vector.shape_cast %2 : vector<1x18x18x4xf32> to vector<18x18x4xf32>
    %cst = arith.constant 0.000000e+00 : f32
    %4 = vector.broadcast %cst : f32 to vector<18x18x4xf32>
    %5 = arith.maximumf %3, %4 : vector<18x18x4xf32>
    %6 = vector.extract_strided_slice %5 {offsets = [0, 0, 0], sizes = [16, 16, 4], strides = [1, 1, 1]} : vector<18x18x4xf32> to vector<16x16x4xf32>
    %7 = vector.shape_cast %6 : vector<16x16x4xf32> to vector<256x4xf32>
    %8 = vector.extract_strided_slice %5 {offsets = [0, 1, 0], sizes = [16, 16, 4], strides = [1, 1, 1]} : vector<18x18x4xf32> to vector<16x16x4xf32>
    %9 = vector.shape_cast %8 : vector<16x16x4xf32> to vector<256x4xf32>
    %10 = vector.extract_strided_slice %5 {offsets = [0, 2, 0], sizes = [16, 16, 4], strides = [1, 1, 1]} : vector<18x18x4xf32> to vector<16x16x4xf32>
    %11 = vector.shape_cast %10 : vector<16x16x4xf32> to vector<256x4xf32>
    %12 = vector.extract_strided_slice %5 {offsets = [1, 0, 0], sizes = [16, 16, 4], strides = [1, 1, 1]} : vector<18x18x4xf32> to vector<16x16x4xf32>
    %13 = vector.shape_cast %12 : vector<16x16x4xf32> to vector<256x4xf32>
    %14 = vector.extract_strided_slice %5 {offsets = [1, 1, 0], sizes = [16, 16, 4], strides = [1, 1, 1]} : vector<18x18x4xf32> to vector<16x16x4xf32>
    %15 = vector.shape_cast %14 : vector<16x16x4xf32> to vector<256x4xf32>
    %16 = vector.extract_strided_slice %5 {offsets = [1, 2, 0], sizes = [16, 16, 4], strides = [1, 1, 1]} : vector<18x18x4xf32> to vector<16x16x4xf32>
    %17 = vector.shape_cast %16 : vector<16x16x4xf32> to vector<256x4xf32>
    %18 = vector.extract_strided_slice %5 {offsets = [2, 0, 0], sizes = [16, 16, 4], strides = [1, 1, 1]} : vector<18x18x4xf32> to vector<16x16x4xf32>
    %19 = vector.shape_cast %18 : vector<16x16x4xf32> to vector<256x4xf32>
    %20 = vector.extract_strided_slice %5 {offsets = [2, 1, 0], sizes = [16, 16, 4], strides = [1, 1, 1]} : vector<18x18x4xf32> to vector<16x16x4xf32>
    %21 = vector.shape_cast %20 : vector<16x16x4xf32> to vector<256x4xf32>
    %22 = vector.extract_strided_slice %5 {offsets = [2, 2, 0], sizes = [16, 16, 4], strides = [1, 1, 1]} : vector<18x18x4xf32> to vector<16x16x4xf32>
    %23 = vector.shape_cast %22 : vector<16x16x4xf32> to vector<256x4xf32>
    %24 = tpu.concatenate %7, %9, %11, %13, %15, %17, %19, %21, %23 in 1 : vector<256x4xf32>, vector<256x4xf32>, vector<256x4xf32>, vector<256x4xf32>, vector<256x4xf32>, vector<256x4xf32>, vector<256x4xf32>, vector<256x4xf32>, vector<256x4xf32> -> vector<256x36xf32>
    %c0_2 = arith.constant 0 : index
    %c0_3 = arith.constant 0 : index
    %25 = vector.load %arg3[%c0_2, %c0_3] : memref<36x128xf32, #tpu.memory_space<vmem>>, vector<36x128xf32>
    %cst_4 = arith.constant dense<0.000000e+00> : vector<256x128xf32>
    %26 = tpu.matmul %24, %25, %cst_4 {dimension_numbers = #tpu.dot_dimension_numbers<[1], [0], [0], [1], [0, 0, 1, 1], [], []>} : vector<256x36xf32>, vector<36x128xf32>, vector<256x128xf32> -> vector<256x128xf32>
    %c0_5 = arith.constant 0 : index
    %c0_6 = arith.constant 0 : index
    %c0_7 = arith.constant 0 : index
    %27 = vector.load %arg4[%c0_5, %c0_6, %c0_7] : memref<1x256x128xf32, #tpu.memory_space<vmem>>, vector<1x256x128xf32>
    %28 = vector.shape_cast %27 : vector<1x256x128xf32> to vector<256x128xf32>
    %29 = vector.shape_cast %26 : vector<256x128xf32> to vector<1x256x128xf32>
    tpu.vector_store %arg4[%c0_5, %c0_6, %c0_7], %29 {strides = array<i32>} : memref<1x256x128xf32, #tpu.memory_space<vmem>>, vector<1x256x128xf32>,
    %cst_8 = arith.constant dense<0.000000e+00> : vector<128xf32>
    %30 = vector.multi_reduction <add>, %26, %cst_8 [0] : vector<256x128xf32> to vector<128xf32>
    %31 = vector.shape_cast %30 : vector<128xf32> to vector<1x128xf32>
    %32 = arith.mulf %26, %26 : vector<256x128xf32>
    %cst_9 = arith.constant dense<0.000000e+00> : vector<128xf32>
    %33 = vector.multi_reduction <add>, %32, %cst_9 [0] : vector<256x128xf32> to vector<128xf32>
    %34 = vector.shape_cast %33 : vector<128xf32> to vector<1x128xf32>
    %35 = tpu.concatenate %31, %34 in 0 : vector<1x128xf32>, vector<1x128xf32> -> vector<2x128xf32>
    %c0_10 = arith.constant 0 : index
    %c0_11 = arith.constant 0 : index
    %c0_12 = arith.constant 0 : index
    %c0_13 = arith.constant 0 : index
    %36 = vector.load %arg5[%c0_10, %c0_11, %c0_12, %c0_13] : memref<1x1x2x128xf32, #tpu.memory_space<vmem>>, vector<1x1x2x128xf32>
    %37 = vector.shape_cast %36 : vector<1x1x2x128xf32> to vector<2x128xf32>
    %38 = vector.shape_cast %35 : vector<2x128xf32> to vector<1x1x2x128xf32>
    tpu.vector_store %arg5[%c0_10, %c0_11, %c0_12, %c0_13], %38 {strides = array<i32>} : memref<1x1x2x128xf32, #tpu.memory_space<vmem>>, vector<1x1x2x128xf32>,
    return
  }
  func.func @transform_0(%arg0: i32, %arg1: i32) -> (i32, i32, i32, i32) {
    %c0_i32 = arith.constant 0 : i32
    %c0_i32_0 = arith.constant 0 : i32
    %c0_i32_1 = arith.constant 0 : i32
    %c0_i32_2 = arith.constant 0 : i32
    return %arg0, %c0_i32, %c0_i32_0, %c0_i32_1 : i32, i32, i32, i32
  }
  func.func @transform_1(%arg0: i32, %arg1: i32) -> (i32, i32) {
    %c0_i32 = arith.constant 0 : i32
    %c0_i32_0 = arith.constant 0 : i32
    %c0_i32_1 = arith.constant 0 : i32
    return %c0_i32, %c0_i32_0 : i32, i32
  }
  func.func @transform_2(%arg0: i32, %arg1: i32) -> (i32, i32, i32) {
    %c0_i32 = arith.constant 0 : i32
    %c0_i32_0 = arith.constant 0 : i32
    return %arg0, %arg1, %c0_i32 : i32, i32, i32
  }
  func.func @transform_3(%arg0: i32, %arg1: i32) -> (i32, i32, i32, i32) {
    %c0_i32 = arith.constant 0 : i32
    %c0_i32_0 = arith.constant 0 : i32
    %c0_i32_1 = arith.constant 0 : i32
    return %arg0, %arg1, %c0_i32, %c0_i32_0 : i32, i32, i32, i32
  }
}

module attributes {stable_mosaic.version = 11 : i64} {
  func.func @_bn_apply_kernel(%arg0: i32, %arg1: i32, %arg2: memref<1x256x128xf32, #tpu.memory_space<vmem>>, %arg3: memref<1x128xf32, #tpu.memory_space<vmem>>, %arg4: memref<1x128xf32, #tpu.memory_space<vmem>>, %arg5: memref<1x256x128xf32, #tpu.memory_space<vmem>>) attributes {dimension_semantics = [#tpu.dimension_semantics<parallel>, #tpu.dimension_semantics<parallel>], iteration_bounds = array<i64: 2, 1>, scalar_prefetch = 0 : i64, scratch_operands = 0 : i64, tpu.core_type = #tpu.core_type<tc>, window_params = [{transform_indices = @transform_0, window_bounds = array<i64: 1, 256, 128>}, {pipeline_mode = #tpu.pipeline_mode<synchronous>, transform_indices = @transform_1, window_bounds = array<i64: 1, 128>}, {pipeline_mode = #tpu.pipeline_mode<synchronous>, transform_indices = @transform_2, window_bounds = array<i64: 1, 128>}, {transform_indices = @transform_3, window_bounds = array<i64: 1, 256, 128>}]} {
    %c0 = arith.constant 0 : index
    %c0_0 = arith.constant 0 : index
    %c0_1 = arith.constant 0 : index
    %0 = vector.load %arg2[%c0, %c0_0, %c0_1] : memref<1x256x128xf32, #tpu.memory_space<vmem>>, vector<1x256x128xf32>
    %1 = vector.shape_cast %0 : vector<1x256x128xf32> to vector<256x128xf32>
    %c0_2 = arith.constant 0 : index
    %c0_3 = arith.constant 0 : index
    %2 = vector.load %arg3[%c0_2, %c0_3] : memref<1x128xf32, #tpu.memory_space<vmem>>, vector<1x128xf32>
    %3 = vector.broadcast %2 : vector<1x128xf32> to vector<256x128xf32>
    %4 = arith.mulf %1, %3 : vector<256x128xf32>
    %c0_4 = arith.constant 0 : index
    %c0_5 = arith.constant 0 : index
    %5 = vector.load %arg4[%c0_4, %c0_5] : memref<1x128xf32, #tpu.memory_space<vmem>>, vector<1x128xf32>
    %6 = vector.broadcast %5 : vector<1x128xf32> to vector<256x128xf32>
    %7 = arith.addf %4, %6 : vector<256x128xf32>
    %c0_6 = arith.constant 0 : index
    %c0_7 = arith.constant 0 : index
    %c0_8 = arith.constant 0 : index
    %8 = vector.load %arg5[%c0_6, %c0_7, %c0_8] : memref<1x256x128xf32, #tpu.memory_space<vmem>>, vector<1x256x128xf32>
    %9 = vector.shape_cast %8 : vector<1x256x128xf32> to vector<256x128xf32>
    %10 = vector.shape_cast %7 : vector<256x128xf32> to vector<1x256x128xf32>
    tpu.vector_store %arg5[%c0_6, %c0_7, %c0_8], %10 {strides = array<i32>} : memref<1x256x128xf32, #tpu.memory_space<vmem>>, vector<1x256x128xf32>,
    return
  }
  func.func @transform_0(%arg0: i32, %arg1: i32) -> (i32, i32, i32) {
    %c0_i32 = arith.constant 0 : i32
    %c0_i32_0 = arith.constant 0 : i32
    return %arg0, %arg1, %c0_i32 : i32, i32, i32
  }
  func.func @transform_1(%arg0: i32, %arg1: i32) -> (i32, i32) {
    %c0_i32 = arith.constant 0 : i32
    %c0_i32_0 = arith.constant 0 : i32
    %c0_i32_1 = arith.constant 0 : i32
    return %c0_i32, %c0_i32_0 : i32, i32
  }
  func.func @transform_2(%arg0: i32, %arg1: i32) -> (i32, i32) {
    %c0_i32 = arith.constant 0 : i32
    %c0_i32_0 = arith.constant 0 : i32
    %c0_i32_1 = arith.constant 0 : i32
    return %c0_i32, %c0_i32_0 : i32, i32
  }
  func.func @transform_3(%arg0: i32, %arg1: i32) -> (i32, i32, i32) {
    %c0_i32 = arith.constant 0 : i32
    %c0_i32_0 = arith.constant 0 : i32
    return %arg0, %arg1, %c0_i32 : i32, i32, i32
  }
}

</mosaic_0001>

<bundles_post_ra>
// kernel: relu_conv_bn.3
= control target key start
LH: loop header
LB: loop body
LE: loop exit
PB: predicated region body
PF: predicated region fallthrough
CT: control target
= control target key end

     0   :  { %s522_s12 = smov 0   ;;  %s524_s13 = smov 0   ;;  %s704_s0 = inlined_call_operand.vmem [shape: f32[2,256,128], index: 0, kind: input, shape index: {}, may-alias: {0,3}]   ;;  %s705_s1 = inlined_call_operand.vmem [shape: f32[1,128], index: 1, kind: input, shape index: {}]   ;;  %s706_s2 = inlined_call_operand.vmem [shape: f32[1,128], index: 2, kind: input, shape index: {}]   ;;  %s707_s3 = inlined_call_operand.vmem [shape: f32[2,256,128], index: 3, kind: output, shape index: {}, may-alias: {0,3}]  }
   0x1   :  { %s526_s14 = smov 0  }
   0x2 LB: > { %s25_s15 = sadd.s32 1, %s496_s13  ;;  %p443_p0 = scmp.ge.s32.totalorder %s500_s14, 1  ;;  %s500_s14 = sphi %s526_s14, %s13_s14   ;;  %s496_s13 = sphi %s524_s13, %s709_s13   ;;  %s492_s12 = sphi %s522_s12, %s708_s12  }
   0x3   : > { %p27_p1 = scmp.ge.s32.totalorder %s25_s15, 2  ;;  %p158_p2 = scmp.lt.s32.totalorder %s500_s14, 3 }
   0x5   : > { %s711_s15 = smov (%p27_p1, %s25_s15), 0  ;;  %p159_p3 = pnand %p443_p0, %p158_p2 }
   0x6   : > { %p191_p4 = scmp.lt.s32.totalorder (!%p159_p3), %s492_s12, 1  ;;  %v546_v0 = vld [vmem:[%s705_s1] ss:$0 sm:$0xff] (!%p159_p3) }
   0x7   : > { %162 = sbr.rel (%p159_p3) target bundleno = 44 (0x2c), region = 32  ;;  %v558_v1 = vld [vmem:[%s706_s2] ss:$0 sm:$0xff] (!%p159_p3) }
   0xe   : > { %s713_s12 = smov (!%p191_p4, %s492_s12), 1 }
   0xf   : > { %s452_s16 = sshll.u32 %s713_s12, 8 }
  0x10   : > { %s553_s21 = scalar_lea.vmem %s704_s0, %s452_s16  ;;  %s614_s26 = scalar_lea.vmem %s707_s3, %s452_s16 }
  0x11   : > { %v210_v2 = vld [vmem:[%s553_s21] sm:$0xff]  ;;  %v211_v3 = vld [vmem:[%s553_s21 + $0x8] sm:$0xff]  ;;  %v212_v4 = vld [vmem:[%s553_s21 + $0x10] sm:$0xff] }
  0x12   : > { %v213_v5 = vld [vmem:[%s553_s21 + $0x18] sm:$0xff]  ;;  %v214_v6 = vld [vmem:[%s553_s21 + $0x20] sm:$0xff]  ;;  %v215_v7 = vld [vmem:[%s553_s21 + $0x28] sm:$0xff]  ;;  %v249_v8 = vmul.f32 %v546_v0, %v210_v2  ;;  %v250_v9 = vmul.f32 %v546_v0, %v211_v3  ;;  %v251_v10 = vmul.f32 %v546_v0, %v212_v4 }
  0x13   : > { %v216_v11 = vld [vmem:[%s553_s21 + $0x30] sm:$0xff]  ;;  %v217_v12 = vld [vmem:[%s553_s21 + $0x38] sm:$0xff]  ;;  %v218_v13 = vld [vmem:[%s553_s21 + $0x40] sm:$0xff]  ;;  %v252_v14 = vmul.f32 %v546_v0, %v213_v5  ;;  %v253_v15 = vmul.f32 %v546_v0, %v214_v6  ;;  %v254_v16 = vmul.f32 %v546_v0, %v215_v7 }
  0x14   : > { %v219_v17 = vld [vmem:[%s553_s21 + $0x48] sm:$0xff]  ;;  %v220_v18 = vld [vmem:[%s553_s21 + $0x50] sm:$0xff]  ;;  %v221_v19 = vld [vmem:[%s553_s21 + $0x58] sm:$0xff]  ;;  %v288_v20 = vadd.f32 %v558_v1, %v249_v8  ;;  %v289_v21 = vadd.f32 %v558_v1, %v250_v9  ;;  %v290_v22 = vadd.f32 %v558_v1, %v251_v10  ;;  %v255_v23 = vmul.f32 %v546_v0, %v216_v11 }
  0x15   : > { %v222_v24 = vld [vmem:[%s553_s21 + $0x60] sm:$0xff]  ;;  %v223_v25 = vld [vmem:[%s553_s21 + $0x68] sm:$0xff]  ;;  %v224_v26 = vld [vmem:[%s553_s21 + $0x70] sm:$0xff]  ;;  %v291_v27 = vadd.f32 %v558_v1, %v252_v14  ;;  %v292_v28 = vadd.f32 %v558_v1, %v253_v15  ;;  %v293_v29 = vadd.f32 %v558_v1, %v254_v16  ;;  %v256_v30 = vmul.f32 %v546_v0, %v217_v12 }
  0x16   : > { %v225_v31 = vld [vmem:[%s553_s21 + $0x78] sm:$0xff]  ;;  %v226_v32 = vld [vmem:[%s553_s21 + $0x80] sm:$0xff]  ;;  %v294_v33 = vadd.f32 %v558_v1, %v255_v23  ;;  %v257_v34 = vmul.f32 %v546_v0, %v218_v13  ;;  %v258_v35 = vmul.f32 %v546_v0, %v219_v17  ;;  %v259_v36 = vmul.f32 %v546_v0, %v220_v18  ;;  %v227_v37 = vld [vmem:[%s553_s21 + $0x88] sm:$0xff] }
  0x17   : > { %v228_v38 = vld [vmem:[%s553_s21 + $0x90] sm:$0xff]  ;;  %v229_v39 = vld [vmem:[%s553_s21 + $0x98] sm:$0xff]  ;;  %v295_v40 = vadd.f32 %v558_v1, %v256_v30  ;;  %v260_v41 = vmul.f32 %v546_v0, %v221_v19  ;;  %v261_v42 = vmul.f32 %v546_v0, %v222_v24  ;;  %v262_v43 = vmul.f32 %v546_v0, %v223_v25  ;;  %v230_v44 = vld [vmem:[%s553_s21 + $0xa0] sm:$0xff] }
  0x18   : > { %v231_v45 = vld [vmem:[%s553_s21 + $0xa8] sm:$0xff]  ;;  %v232_v46 = vld [vmem:[%s553_s21 + $0xb0] sm:$0xff]  ;;  %v296_v47 = vadd.f32 %v558_v1, %v257_v34  ;;  %v297_v48 = vadd.f32 %v558_v1, %v258_v35  ;;  %v298_v49 = vadd.f32 %v558_v1, %v259_v36  ;;  %v263_v50 = vmul.f32 %v546_v0, %v224_v26  ;;  %v233_v51 = vld [vmem:[%s553_s21 + $0xb8] sm:$0xff] }
  0x19   : > { %v234_v52 = vld [vmem:[%s553_s21 + $0xc0] sm:$0xff]  ;;  %v235_v53 = vld [vmem:[%s553_s21 + $0xc8] sm:$0xff]  ;;  %v299_v54 = vadd.f32 %v558_v1, %v260_v41  ;;  %v300_v55 = vadd.f32 %v558_v1, %v261_v42  ;;  %v301_v56 = vadd.f32 %v558_v1, %v262_v43  ;;  %v264_v57 = vmul.f32 %v546_v0, %v225_v31  ;;  %v236_v58 = vld [vmem:[%s553_s21 + $0xd0] sm:$0xff] }
  0x1a   : > { %v237_v59 = vld [vmem:[%s553_s21 + $0xd8] sm:$0xff]  ;;  %v238_v60 = vld [vmem:[%s553_s21 + $0xe0] sm:$0xff]  ;;  %v302_v61 = vadd.f32 %v558_v1, %v263_v50  ;;  %v265_v62 = vmul.f32 %v546_v0, %v226_v32  ;;  %v266_v63 = vmul.f32 %v546_v0, %v227_v37  ;;  %v267_v2 = vmul.f32 %v546_v0, %v228_v38  ;;  %v239_v3 = vld [vmem:[%s553_s21 + $0xe8] sm:$0xff] }
  0x1b   : > { %v240_v4 = vld [vmem:[%s553_s21 + $0xf0] sm:$0xff]  ;;  %v241_v5 = vld [vmem:[%s553_s21 + $0xf8] sm:$0xff]  ;;  %v303_v6 = vadd.f32 %v558_v1, %v264_v57  ;;  %v268_v7 = vmul.f32 %v546_v0, %v229_v39  ;;  %v269_v8 = vmul.f32 %v546_v0, %v230_v44  ;;  %v270_v9 = vmul.f32 %v546_v0, %v231_v45 }
  0x1c   : > { %320 = vst [vmem:[%s614_s26] sm:$0xff] %v288_v20  ;;  %321 = vst [vmem:[%s614_s26 + $0x8] sm:$0xff] %v289_v21  ;;  %v304_v10 = vadd.f32 %v558_v1, %v265_v62  ;;  %v305_v11 = vadd.f32 %v558_v1, %v266_v63  ;;  %v306_v12 = vadd.f32 %v558_v1, %v267_v2 }
  0x1d   : > { %322 = vst [vmem:[%s614_s26 + $0x10] sm:$0xff] %v290_v22  ;;  %323 = vst [vmem:[%s614_s26 + $0x18] sm:$0xff] %v291_v27  ;;  %v271_v13 = vmul.f32 %v546_v0, %v232_v46  ;;  %v307_v14 = vadd.f32 %v558_v1, %v268_v7  ;;  %v308_v15 = vadd.f32 %v558_v1, %v269_v8 }
  0x1e   : > { %324 = vst [vmem:[%s614_s26 + $0x20] sm:$0xff] %v292_v28  ;;  %325 = vst [vmem:[%s614_s26 + $0x28] sm:$0xff] %v293_v29  ;;  %v309_v16 = vadd.f32 %v558_v1, %v270_v9  ;;  %v272_v17 = vmul.f32 %v546_v0, %v233_v51  ;;  %v273_v19 = vmul.f32 %v546_v0, %v234_v52 }
  0x1f   : > { %326 = vst [vmem:[%s614_s26 + $0x30] sm:$0xff] %v294_v33  ;;  %327 = vst [vmem:[%s614_s26 + $0x38] sm:$0xff] %v295_v40  ;;  %v310_v18 = vadd.f32 %v558_v1, %v271_v13  ;;  %v274_v20 = vmul.f32 %v546_v0, %v235_v53  ;;  %v275_v21 = vmul.f32 %v546_v0, %v236_v58 }
  0x20   : > { %328 = vst [vmem:[%s614_s26 + $0x40] sm:$0xff] %v296_v47  ;;  %329 = vst [vmem:[%s614_s26 + $0x48] sm:$0xff] %v297_v48  ;;  %v311_v22 = vadd.f32 %v558_v1, %v272_v17  ;;  %v276_v23 = vmul.f32 %v546_v0, %v237_v59  ;;  %v277_v24 = vmul.f32 %v546_v0, %v238_v60 }
  0x21   : > { %330 = vst [vmem:[%s614_s26 + $0x50] sm:$0xff] %v298_v49  ;;  %331 = vst [vmem:[%s614_s26 + $0x58] sm:$0xff] %v299_v54  ;;  %v278_v25 = vmul.f32 %v546_v0, %v239_v3  ;;  %v312_v26 = vadd.f32 %v558_v1, %v273_v19  ;;  %v313_v27 = vadd.f32 %v558_v1, %v274_v20 }
  0x22   : > { %332 = vst [vmem:[%s614_s26 + $0x60] sm:$0xff] %v300_v55  ;;  %333 = vst [vmem:[%s614_s26 + $0x68] sm:$0xff] %v301_v56  ;;  %v314_v28 = vadd.f32 %v558_v1, %v275_v21  ;;  %v279_v29 = vmul.f32 %v546_v0, %v240_v4  ;;  %v315_v30 = vadd.f32 %v558_v1, %v276_v23 }
  0x23   : > { %334 = vst [vmem:[%s614_s26 + $0x70] sm:$0xff] %v302_v61  ;;  %335 = vst [vmem:[%s614_s26 + $0x78] sm:$0xff] %v303_v6  ;;  %v316_v31 = vadd.f32 %v558_v1, %v277_v24  ;;  %v317_v32 = vadd.f32 %v558_v1, %v278_v25  ;;  %v280_v33 = vmul.f32 %v546_v0, %v241_v5 }
  0x24   : > { %336 = vst [vmem:[%s614_s26 + $0x80] sm:$0xff] %v304_v10  ;;  %337 = vst [vmem:[%s614_s26 + $0x88] sm:$0xff] %v305_v11  ;;  %v318_v34 = vadd.f32 %v558_v1, %v279_v29 }
  0x25   : > { %338 = vst [vmem:[%s614_s26 + $0x90] sm:$0xff] %v306_v12  ;;  %339 = vst [vmem:[%s614_s26 + $0x98] sm:$0xff] %v307_v14  ;;  %v319_v35 = vadd.f32 %v558_v1, %v280_v33 }
  0x26   : > { %340 = vst [vmem:[%s614_s26 + $0xa0] sm:$0xff] %v308_v15  ;;  %341 = vst [vmem:[%s614_s26 + $0xa8] sm:$0xff] %v309_v16 }
  0x27   : > { %342 = vst [vmem:[%s614_s26 + $0xb0] sm:$0xff] %v310_v18  ;;  %343 = vst [vmem:[%s614_s26 + $0xb8] sm:$0xff] %v311_v22 }
  0x28   : > { %344 = vst [vmem:[%s614_s26 + $0xc0] sm:$0xff] %v312_v26  ;;  %345 = vst [vmem:[%s614_s26 + $0xc8] sm:$0xff] %v313_v27 }
  0x29   : > { %346 = vst [vmem:[%s614_s26 + $0xd0] sm:$0xff] %v314_v28  ;;  %347 = vst [vmem:[%s614_s26 + $0xd8] sm:$0xff] %v315_v30 }
  0x2a   : > { %348 = vst [vmem:[%s614_s26 + $0xe0] sm:$0xff] %v316_v31  ;;  %349 = vst [vmem:[%s614_s26 + $0xe8] sm:$0xff] %v317_v32 }
  0x2b   : > { %350 = vst [vmem:[%s614_s26 + $0xf0] sm:$0xff] %v318_v34  ;;  %351 = vst [vmem:[%s614_s26 + $0xf8] sm:$0xff] %v319_v35 }
  0x2c PF: > { %s13_s14 = sadd.s32 1, %s500_s14   ;;  %s708_s12 = smov %s496_s13 }
  0x2d   : > { %p10_p5 = scmp.ge.s32.totalorder %s13_s14, 4   ;;  %s709_s13 = smov %s711_s15 }
  0x2f   :  { %12 = sbr.rel (!%p10_p5) target bundleno = 2 (0x2), region = 62 }

// kernel: relu_conv_bn.2
= control target key start
LH: loop header
LB: loop body
LE: loop exit
PB: predicated region body
PF: predicated region fallthrough
CT: control target
= control target key end

     0   :  { %s2427_s12 = smov 0   ;;  %s2429_s13 = smov 0   ;;  %s4058_s0 = inlined_call_operand.vmem [shape: f32[2,18,18,4], index: 0, kind: input, shape index: {}]   ;;  %s4059_s1 = inlined_call_operand.vmem [shape: f32[36,128], index: 1, kind: input, shape index: {}]   ;;  %s4060_s2 = inlined_call_operand.vmem [shape: f32[2,256,128], index: 2, kind: output, shape index: {0}]   ;;  %s4061_s3 = inlined_call_operand.vmem [shape: f32[2,1,2,128], index: 3, kind: output, shape index: {1}]  }
   0x1   :  { %s2431_s14 = smov 0  }
   0x2 LB: > { %s26_s15 = sadd.s32 1, %s2393_s13  ;;  %p2192_p0 = scmp.ge.s32.totalorder %s2397_s14, 1  ;;  %s2397_s14 = sphi %s2431_s14, %s14_s14   ;;  %s2393_s13 = sphi %s2429_s13, %s4344_s13   ;;  %s2389_s12 = sphi %s2427_s12, %s4343_s12  }
   0x3   : > { %p28_p1 = scmp.ge.s32.totalorder %s26_s15, 2  ;;  %p156_p2 = scmp.lt.s32.totalorder %s2397_s14, 3 }
   0x5   : > { %s4346_s15 = smov (%p28_p1, %s26_s15), 0  ;;  %p157_p3 = pnand %p2192_p0, %p156_p2 }
   0x7   : > { %160 = sbr.rel (%p157_p3) target bundleno = 885 (0x375), region = 28 }
   0xe   : > { %p191_p4 = scmp.lt.s32.totalorder %s2389_s12, 1  ;;  %vm372_vm0 = vcmask 1046528   ;;  %s2399_s20 = smov 4   ;;  %vm453_vm1 = vcmask 1045504   ;;  %vm1694_vm2 = vcmask 1043456   ;;  %vm1328_vm3 = vcmask 31744  }
   0xf   : > { %s2400_s21 = smov 8   ;;  %s2401_s22 = smov 12   ;;  %vm1361_vm4 = vcmask 64512   ;;  %vm1394_vm5 = vcmask 97280   ;;  %vm1427_vm6 = vcmask 130048   ;;  %vm1460_vm7 = vcmask 162816  }
  0x10   : > { %s4348_s12 = smov (!%p191_p4, %s2389_s12), 1  ;;  %s2402_s23 = smov 16   ;;  %vm1493_vm8 = vcmask 195584   ;;  %vm1526_vm9 = vcmask 228352   ;;  %vm1559_vm10 = vcmask 261120   ;;  %vm1597_vm11 = vcmask 293888  }
  0x11   : > { %s2342_s16 = smul.u32 432, %s4348_s12  ;;  %s2403_s28 = smov 20   ;;  %vm2061_vm12 = vcmask 1040384  }
  0x12   : > { %s2404_s6 = smov 24   ;;  %s2405_s9 = smov 28  }
  0x13   : > { %s2451_s19 = scalar_lea.vmem %s4058_s0, %s2342_s16  ;;  %s2406_s10 = smov 32  }
  0x14   : > { %v219_v0 = vld [vmem:[%s2451_s19 + $0x18] sm:$0xff]  ;;  %v220_v1 = vld [vmem:[%s2451_s19 + $0x20] sm:$0xff]  ;;  %v217_v5 = vld [vmem:[%s2451_s19 + $0x8] sm:$0xff]  ;;  %s2232_s11 = sshll.u32 %s4348_s12, 8 }
  0x15   : > { %v216_v2 = vld [vmem:[%s2451_s19] sm:$0xff]  ;;  %v2456_v3 = vmax.f32 %v219_v0, 0.0  ;;  %v2458_v4 = vmax.f32 %v220_v1, 0.0  ;;  %v2464_v7 = vld [vmem:[%s2451_s19 + $0x28] sm:$0x3]  ;;  %v2466_v8 = vmax.f32 %v217_v5, 0.0  ;;  %s3916_s18 = scalar_lea.vmem %s4060_s2, %s2232_s11 }
  0x16   : > { %v2461_v6 = vmax.f32 %v216_v2, 0.0  ;;  %v4070_v9 = vmax.f32 %v2464_v7, 0.0  ;;  %v2470_v10 = vld [vmem:[%s2451_s19 + $0x10] sm:$0x3]  ;;  %v223_v11 = vld [vmem:[%s2451_s19 + $0x38] sm:$0xff]  ;;  %v225_v27 = vld [vmem:[%s2451_s19 + $0x48] sm:$0xff] }
  0x17   : > { %4177 = vst [vmem:[#allocation2_spill] sm:$0xff] %v2456_v3  ;;  %4178 = vst [vmem:[#allocation3_spill] sm:$0xff] %v2458_v4  ;;  %v222_v12 = vld [vmem:[%s2451_s19 + $0x30] sm:$0xff]  ;;  %v378_v13 = vrot.slane %v2456_v3, 1  ;;  %v379_v14 = vrot.slane %v2458_v4, 1  ;;  %v4071_v16 = vmax.f32 %v2470_v10, 0.0 }
  0x18   : > { %4179 = vst [vmem:[#allocation4_spill] sm:$0xff] %v2461_v6  ;;  %4180 = vst [vmem:[#allocation5_spill] sm:$0xff] %v2466_v8  ;;  %v373_v15 = vrot.slane %v2461_v6, 1  ;;  %v2479_v17 = vld [vmem:[%s2451_s19 + $0x40] sm:$0x3]  ;;  %v374_v18 = vrot.slane %v2466_v8, 1 }
  0x19   : > { %v381_v19 = vrot.slane %v4070_v9, 1  ;;  %v2484_v20 = vmax.f32 %v223_v11, 0.0  ;;  %v4069_v21 = vmax.f32 %v2479_v17, 0.0  ;;  %v226_v22 = vld [vmem:[%s2451_s19 + $0x50] sm:$0xff]  ;;  %v2489_v23 = vsel %vm372_vm0, %v378_v13, %v379_v14  ;;  %v2496_v26 = vld [vmem:[%s2451_s19 + $0x58] sm:$0x3] }
  0x1a   : > { %v376_v24 = vrot.slane %v4071_v16, 1  ;;  %v2493_v25 = vmax.f32 %v222_v12, 0.0  ;;  %564 = vrot.lane.b32.xlu1 %v2489_v23, %s2399_s20  ;;  %v375_v28 = vsel %vm372_vm0, %v373_v15, %v374_v18  ;;  %v2502_v29 = vmax.f32 %v226_v22, 0.0  ;;  %v229_v37 = vld [vmem:[%s2451_s19 + $0x68] sm:$0xff]  ;;  %v2518_v38 = vld [vmem:[%s2451_s19 + $0x70] sm:$0x3] }
  0x1b   : > { %4181 = vst [vmem:[#allocation6_spill] sm:$0xff] %v2484_v20  ;;  %560 = vrot.lane.b32.xlu0 %v375_v28, %s2399_s20  ;;  %v2506_v30 = vsel %vm372_vm0, %v379_v14, %v381_v19  ;;  %v384_v31 = vrot.slane %v2484_v20, 1  ;;  %v386_v32 = vrot.slane %v4069_v21, 1  ;;  %v4068_v33 = vmax.f32 %v2496_v26, 0.0  ;;  %v228_v39 = vld [vmem:[%s2451_s19 + $0x60] sm:$0xff]  ;;  %v231_v50 = vld [vmem:[%s2451_s19 + $0x78] sm:$0xff] }
  0x1c   : > { %4182 = vst [vmem:[#allocation7_spill] sm:$0xff] %v2493_v25  ;;  %v377_v34 = vsel %vm372_vm0, %v374_v18, %v376_v24  ;;  %v383_v35 = vrot.slane %v2493_v25, 1  ;;  %v2514_v36 = vmax.f32 %v225_v27, 0.0  ;;  %v389_v40 = vrot.slane %v2502_v29, 1  ;;  %v232_v45 = vld [vmem:[%s2451_s19 + $0x80] sm:$0xff]  ;;  %v235_v59 = vld [vmem:[%s2451_s19 + $0x98] sm:$0xff] }
  0x1d   : > { %v2526_v41 = vsel %vm372_vm0, %v384_v31, %v386_v32  ;;  %v391_v42 = vrot.slane %v4068_v33, 1  ;;  %v2530_v43 = vmax.f32 %v229_v37, 0.0  ;;  %v4066_v44 = vmax.f32 %v2518_v38, 0.0  ;;  %v2541_v49 = vld [vmem:[%s2451_s19 + $0x88] sm:$0x3]  ;;  %v234_v61 = vld [vmem:[%s2451_s19 + $0x90] sm:$0xff] }
  0x1e   : > { %4183 = vst [vmem:[#allocation8_spill] sm:$0xff] %v2514_v36  ;;  %566 = vrot.lane.b32.xlu1 %v2506_v30, %s2399_s20  ;;  %4184 = vst [vmem:[#allocation9_spill] sm:$0xff] %v2526_v41  ;;  %v2535_v46 = vsel %vm372_vm0, %v383_v35, %v384_v31  ;;  %v388_v47 = vrot.slane %v2514_v36, 1  ;;  %v2538_v48 = vmax.f32 %v228_v39, 0.0  ;;  %v2546_v51 = vmax.f32 %v232_v45, 0.0  ;;  %v238_v5 = vld [vmem:[%s2451_s19 + $0xb0] sm:$0xff] }
  0x1f   : > { %562 = vrot.lane.b32.xlu0 %v377_v34, %s2399_s20  ;;  %v2551_v52 = vsel %vm372_vm0, %v389_v40, %v391_v42  ;;  %v394_v53 = vrot.slane %v2530_v43, 1  ;;  %v396_v54 = vrot.slane %v4066_v44, 1  ;;  %v4065_v55 = vmax.f32 %v2541_v49, 0.0  ;;  %v2565_v60 = vld [vmem:[%s2451_s19 + $0xa0] sm:$0x3]  ;;  %v237_v15 = vld [vmem:[%s2451_s19 + $0xa8] sm:$0xff] }
  0x20   : > { %4185 = vst [vmem:[#allocation10_spill] sm:$0xff] %v2551_v52  ;;  %v2558_v56 = vsel %vm372_vm0, %v388_v47, %v389_v40  ;;  %v393_v57 = vrot.slane %v2538_v48, 1  ;;  %v2561_v58 = vmax.f32 %v231_v50, 0.0  ;;  %v399_v62 = vrot.slane %v2546_v51, 1  ;;  %v2583_v11 = vld [vmem:[%s2451_s19 + $0xb8] sm:$0x3] }
  0x21   : > { %4186 = vst [vmem:[#allocation11_spill] sm:$0xff] %v2558_v56  ;;  %v2574_v63 = vsel %vm372_vm0, %v394_v53, %v396_v54  ;;  %v401_v0 = vrot.slane %v4065_v55, 1  ;;  %v2578_v1 = vmax.f32 %v235_v59, 0.0  ;;  %v4064_v2 = vmax.f32 %v2565_v60, 0.0  ;;  %v241_v34 = vld [vmem:[%s2451_s19 + $0xc8] sm:$0xff]  ;;  %v240_v37 = vld [vmem:[%s2451_s19 + $0xc0] sm:$0xff] }
  0x22   : > { %570 = vrot.lane.b32.xlu1 %v2526_v41, %s2399_s20  ;;  %4187 = vst [vmem:[#allocation12_spill] sm:$0xff] %v2574_v63  ;;  %v2586_v12 = vsel %vm372_vm0, %v393_v57, %v394_v53  ;;  %v398_v13 = vrot.slane %v2561_v58, 1  ;;  %v2589_v14 = vmax.f32 %v234_v61, 0.0  ;;  %v2594_v18 = vmax.f32 %v238_v5, 0.0  ;;  %v2613_v35 = vld [vmem:[%s2451_s19 + $0xd0] sm:$0x3] }
  0x23   : > { %568 = vrot.lane.b32.xlu0 %v2535_v46, %s2399_s20  ;;  %4188 = vst [vmem:[#allocation13_spill] sm:$0xff] %v2586_v12  ;;  %v4063_v19 = vmax.f32 %v2583_v11, 0.0  ;;  %v2600_v22 = vsel %vm372_vm0, %v399_v62, %v401_v0  ;;  %v404_v24 = vrot.slane %v2578_v1, 1  ;;  %v406_v27 = vrot.slane %v4064_v2, 1  ;;  %v244_v57 = vld [vmem:[%s2451_s19 + $0xe0] sm:$0xff]  ;;  %v243_v61 = vld [vmem:[%s2451_s19 + $0xd8] sm:$0xff] }
  0x24   : > { %4189 = vst [vmem:[#allocation14_spill] sm:$0xff] %v2600_v22  ;;  %v2606_v28 = vsel %vm372_vm0, %v398_v13, %v399_v62  ;;  %v403_v31 = vrot.slane %v2589_v14, 1  ;;  %v2609_v32 = vmax.f32 %v237_v15, 0.0  ;;  %v409_v39 = vrot.slane %v2594_v18, 1  ;;  %v2637_v59 = vld [vmem:[%s2451_s19 + $0xe8] sm:$0x3] }
  0x25   : > { %4190 = vst [vmem:[#allocation15_spill] sm:$0xff] %v2606_v28  ;;  %v411_v40 = vrot.slane %v4063_v19, 1  ;;  %v2624_v42 = vsel %vm372_vm0, %v404_v24, %v406_v27  ;;  %v2626_v45 = vmax.f32 %v241_v34, 0.0  ;;  %v4062_v47 = vmax.f32 %v2613_v35, 0.0  ;;  %v247_v0 = vld [vmem:[%s2451_s19 + $0xf8] sm:$0xff]  ;;  %v250_v55 = vld [vmem:[%s2451_s19 + $0x110] sm:$0xff] }
  0x26   : > { %574 = vrot.lane.b32.xlu1 %v2551_v52, %s2399_s20  ;;  %4191 = vst [vmem:[#allocation16_spill] sm:$0xff] %v2624_v42  ;;  %v2630_v50 = vsel %vm372_vm0, %v403_v31, %v404_v24  ;;  %v408_v53 = vrot.slane %v2609_v32, 1  ;;  %v2633_v54 = vmax.f32 %v240_v37, 0.0  ;;  %v2651_v15 = vmax.f32 %v244_v57, 0.0  ;;  %v2655_v27 = vld [vmem:[%s2451_s19 + $0x100] sm:$0x3] }
  0x27   : > { %572 = vrot.lane.b32.xlu0 %v2558_v56, %s2399_s20  ;;  %4192 = vst [vmem:[#allocation17_spill] sm:$0xff] %v2630_v50  ;;  %v2643_v62 = vsel %vm372_vm0, %v409_v39, %v411_v40  ;;  %v414_v5 = vrot.slane %v2626_v45, 1  ;;  %v416_v13 = vrot.slane %v4062_v47, 1  ;;  %v4067_v24 = vmax.f32 %v2637_v59, 0.0  ;;  %v246_v40 = vld [vmem:[%s2451_s19 + $0xf0] sm:$0xff] }
  0x28   : > { %4193 = vst [vmem:[#allocation18_spill] sm:$0xff] %v2643_v62  ;;  %v2658_v31 = vsel %vm372_vm0, %v408_v53, %v409_v39  ;;  %v413_v34 = vrot.slane %v2633_v54, 1  ;;  %v2661_v37 = vmax.f32 %v243_v61, 0.0  ;;  %v2666_v57 = vmax.f32 %v247_v0, 0.0  ;;  %v2685_v44 = vld [vmem:[%s2451_s19 + $0x118] sm:$0x3] }
  0x29   : > { %4194 = vst [vmem:[#allocation19_spill] sm:$0xff] %v2658_v31  ;;  %v4072_v47 = vmax.f32 %v2655_v27, 0.0  ;;  %v2672_v19 = vsel %vm372_vm0, %v414_v5, %v416_v13  ;;  %v419_v39 = vrot.slane %v2651_v15, 1  ;;  %v421_v53 = vrot.slane %v4067_v24, 1  ;;  %v249_v13 = vld [vmem:[%s2451_s19 + $0x108] sm:$0xff]  ;;  %v262_v52 = vld [vmem:[%s2451_s19 + $0x170] sm:$0xff] }
  0x2a   : > { %578 = vrot.lane.b32.xlu1 %v2574_v63, %s2399_s20  ;;  %4195 = vst [vmem:[#allocation20_spill] sm:$0xff] %v2672_v19  ;;  %v2678_v61 = vsel %vm372_vm0, %v413_v34, %v414_v5  ;;  %v418_v0 = vrot.slane %v2661_v37, 1  ;;  %v2681_v2 = vmax.f32 %v246_v40, 0.0  ;;  %v424_v24 = vrot.slane %v2666_v57, 1  ;;  %v2781_v56 = vld [vmem:[%s2451_s19 + $0x178] sm:$0x3] }
  0x2b   : > { %576 = vrot.lane.b32.xlu0 %v2586_v12, %s2399_s20  ;;  %4196 = vst [vmem:[#allocation21_spill] sm:$0xff] %v2678_v61  ;;  %v426_v5 = vrot.slane %v4072_v47, 1  ;;  %v2696_v34 = vsel %vm372_vm0, %v419_v39, %v421_v53  ;;  %v2698_v40 = vmax.f32 %v250_v55, 0.0  ;;  %v4087_v33 = vmax.f32 %v2685_v44, 0.0  ;;  %v253_v47 = vld [vmem:[%s2451_s19 + $0x128] sm:$0xff]  ;;  %v256_v53 = vld [vmem:[%s2451_s19 + $0x140] sm:$0xff] }
  0x2c   : > { %4197 = vst [vmem:[#allocation22_spill] sm:$0xff] %v2696_v34  ;;  %v2702_v21 = vsel %vm372_vm0, %v418_v0, %v419_v39  ;;  %v423_v9 = vrot.slane %v2681_v2, 1  ;;  %v2705_v16 = vmax.f32 %v249_v13, 0.0  ;;  %v2723_v13 = vmax.f32 %v253_v47, 0.0 }
  0x2d   : > { %4198 = vst [vmem:[#allocation23_spill] sm:$0xff] %v2702_v21  ;;  %v2715_v55 = vsel %vm372_vm0, %v424_v24, %v426_v5  ;;  %v429_v39 = vrot.slane %v2698_v40, 1  ;;  %v431_v0 = vrot.slane %v4087_v33, 1  ;;  %v2738_v47 = vmax.f32 %v256_v53, 0.0  ;;  %v259_v33 = vld [vmem:[%s2451_s19 + $0x158] sm:$0xff] }
  0x2e   : > { %582 = vrot.lane.b32.xlu1 %v2600_v22, %s2399_s20  ;;  %4199 = vst [vmem:[#allocation24_spill] sm:$0xff] %v2715_v55  ;;  %v2730_v5 = vsel %vm372_vm0, %v423_v9, %v424_v24  ;;  %v434_v9 = vrot.slane %v2723_v13, 1 }
  0x2f   : > { %580 = vrot.lane.b32.xlu0 %v2606_v28, %s2399_s20  ;;  %4200 = vst [vmem:[#allocation25_spill] sm:$0xff] %v2730_v5  ;;  %v439_v22 = vrot.slane %v2738_v47, 1 }
  0x32   : > { %586 = vrot.lane.b32.xlu1 %v2624_v42, %s2399_s20  ;;  %v255_v42 = vld [vmem:[%s2451_s19 + $0x138] sm:$0xff] }
  0x33   : > { %584 = vrot.lane.b32.xlu0 %v2630_v50, %s2399_s20 }
  0x36   : > { %590 = vrot.lane.b32.xlu1 %v2643_v62, %s2399_s20  ;;  %v2744_v62 = vsel %vm372_vm0, %v429_v39, %v431_v0  ;;  %v258_v0 = vld [vmem:[%s2451_s19 + $0x150] sm:$0xff] }
  0x37   : > { %588 = vrot.lane.b32.xlu0 %v2658_v31, %s2399_s20  ;;  %v2727_v31 = vld [vmem:[%s2451_s19 + $0x148] sm:$0x3]  ;;  %4201 = vst [vmem:[#allocation26_spill] sm:$0xff] %v2744_v62  ;;  %v2777_v12 = vmax.f32 %v258_v0, 0.0  ;;  %v4119_v0 = vmax.f32 %v2781_v56, 0.0 }
  0x3a   : > { %594 = vrot.lane.b32.xlu1 %v2672_v19, %s2399_s20  ;;  %v2709_v19 = vld [vmem:[%s2451_s19 + $0x130] sm:$0x3] }
  0x3b   : > { %592 = vrot.lane.b32.xlu0 %v2678_v61, %s2399_s20  ;;  %v252_v61 = vld [vmem:[%s2451_s19 + $0x120] sm:$0xff]  ;;  %v4202_v24 = vmax.f32 %v2709_v19, 0.0 }
  0x3e   : > { %598 = vrot.lane.b32.xlu1 %v2696_v34, %s2399_s20  ;;  %v428_v34 = vrot.slane %v2705_v16, 1 }
  0x3f   : > { %596 = vrot.lane.b32.xlu0 %v2702_v21, %s2399_s20  ;;  %v2733_v21 = vmax.f32 %v252_v61, 0.0  ;;  %v436_v61 = vrot.slane %v4202_v24, 1  ;;  %v4204_v24 = vmax.f32 %v2727_v31, 0.0 }
  0x40   : > { %v2750_v50 = vsel %vm372_vm0, %v428_v34, %v429_v39 }
  0x41   : > { %4203 = vst [vmem:[#allocation27_spill] sm:$0xff] %v2750_v50  ;;  %v433_v53 = vrot.slane %v2733_v21, 1  ;;  %v441_v34 = vrot.slane %v4204_v24, 1  ;;  %v2768_v39 = vsel %vm372_vm0, %v434_v9, %v436_v61  ;;  %v261_v24 = vld [vmem:[%s2451_s19 + $0x168] sm:$0xff] }
  0x42   : > { %602 = vrot.lane.b32.xlu1 %v2715_v55, %s2399_s20  ;;  %v2753_v55 = vmax.f32 %v255_v42, 0.0  ;;  %4205 = vst [vmem:[#allocation28_spill] sm:$0xff] %v2768_v39  ;;  %v2770_v42 = vmax.f32 %v259_v33, 0.0  ;;  %v2801_v41 = vmax.f32 %v261_v24, 0.0 }
  0x43   : > { %600 = vrot.lane.b32.xlu0 %v2730_v5, %s2399_s20  ;;  %v2757_v5 = vld [vmem:[%s2451_s19 + $0x160] sm:$0x3]  ;;  %v2774_v63 = vsel %vm372_vm0, %v433_v53, %v434_v9  ;;  %v2787_v61 = vsel %vm372_vm0, %v439_v22, %v441_v34  ;;  %v2794_v53 = vmax.f32 %v262_v52, 0.0 }
  0x44   : > { %v4114_v28 = vmax.f32 %v2757_v5, 0.0  ;;  %4206 = vst [vmem:[#allocation29_spill] sm:$0xff] %v2774_v63  ;;  %4207 = vst [vmem:[#allocation30_spill] sm:$0xff] %v2787_v61  ;;  %v444_v33 = vrot.slane %v2770_v42, 1 }
  0x45   : > { %v449_v52 = vrot.slane %v2794_v53, 1 }
  0x46   : > { %606 = vrot.lane.b32.xlu1 %v2744_v62, %s2399_s20  ;;  %v438_v62 = vrot.slane %v2753_v55, 1  ;;  %v446_v9 = vrot.slane %v4114_v28, 1  ;;  %v451_v28 = vrot.slane %v4119_v0, 1 }
  0x47   : > { %604 = vrot.lane.b32.xlu0 %v2750_v50, %s2399_s20 }
  0x48   : > { %v2798_v50 = vsel %vm372_vm0, %v438_v62, %v439_v22  ;;  %v2808_v34 = vsel %vm372_vm0, %v444_v33, %v446_v9  ;;  %v448_v62 = vrot.slane %v2801_v41, 1  ;;  %v2822_v24 = vsel %vm372_vm0, %v449_v52, %v451_v28 }
  0x49   : > { %4208 = vst [vmem:[#allocation31_spill] sm:$0xff] %v2798_v50  ;;  %4209 = vst [vmem:[#allocation32_spill] sm:$0xff] %v2808_v34  ;;  %v455_v9 = vrot.slane %v2466_v8, 2  ;;  %v4224_v8 = vmax.f32 %v2613_v35, 0.0 }
  0x4a   : > { %610 = vrot.lane.b32.xlu1 %v2768_v39, %s2399_s20  ;;  %v443_v39 = vrot.slane %v2777_v12, 1  ;;  %4211 = vst [vmem:[#allocation34_spill] sm:$0xff] %v2822_v24  ;;  %v2828_v0 = vsel %vm372_vm0, %v448_v62, %v449_v52  ;;  %v459_v52 = vrot.slane %v2456_v3, 2 }
  0x4b   : > { %608 = vrot.lane.b32.xlu0 %v2774_v63, %s2399_s20  ;;  %4213 = vst [vmem:[#allocation35_spill] sm:$0xff] %v2828_v0  ;;  %v4221_v63 = vmax.f32 %v2583_v11, 0.0  ;;  %v497_v11 = vrot.slane %v4224_v8, 2 }
  0x4c   : > { %v2814_v22 = vsel %vm372_vm0, %v443_v39, %v444_v33  ;;  %v454_v39 = vrot.slane %v2461_v6, 2  ;;  %v460_v33 = vrot.slane %v2458_v4, 2  ;;  %v4227_v6 = vmax.f32 %v2637_v59, 0.0 }
  0x4d   : > { %4210 = vst [vmem:[#allocation33_spill] sm:$0xff] %v2814_v22 }
  0x4e   : > { %614 = vrot.lane.b32.xlu1 %v2787_v61, %s2399_s20  ;;  %v4212_v61 = vmax.f32 %v2470_v10, 0.0  ;;  %v502_v35 = vrot.slane %v4227_v6, 2 }
  0x4f   : > { %612 = vrot.lane.b32.xlu0 %v2798_v50, %s2399_s20 }
  0x50   : > { %v457_v50 = vrot.slane %v4212_v61, 2  ;;  %v456_v61 = vsel %vm453_vm1, %v454_v39, %v455_v9  ;;  %v470_v39 = vrot.slane %v2502_v29, 2 }
  0x52   : > { %618 = vrot.lane.b32.xlu1 %v2808_v34, %s2399_s20  ;;  %v458_v28 = vsel %vm453_vm1, %v455_v9, %v457_v50  ;;  %v4214_v34 = vmax.f32 %v2464_v7, 0.0  ;;  %v4215_v50 = vmax.f32 %v2479_v17, 0.0  ;;  %v2850_v7 = vsel %vm453_vm1, %v459_v52, %v460_v33 }
  0x53   : > { %616 = vrot.lane.b32.xlu0 %v2814_v22, %s2399_s20  ;;  %v4217_v52 = vmax.f32 %v2518_v38, 0.0  ;;  %v4219_v22 = vmax.f32 %v2565_v60, 0.0  ;;  %v492_v60 = vrot.slane %v4221_v63, 2 }
  0x54   : > { %v462_v10 = vrot.slane %v4214_v34, 2  ;;  %v464_v34 = vrot.slane %v2493_v25, 2 }
  0x56   : > { %622 = vrot.lane.b32.xlu1 %v2822_v24, %s2399_s20  ;;  %v2844_v62 = vsel %vm453_vm1, %v460_v33, %v462_v10  ;;  %v465_v24 = vrot.slane %v2484_v20, 2  ;;  %v469_v33 = vrot.slane %v2514_v36, 2 }
  0x57   : > { %620 = vrot.lane.b32.xlu0 %v2828_v0, %s2399_s20  ;;  %v467_v0 = vrot.slane %v4215_v50, 2 }
  0x58   : > { %v2864_v10 = vsel %vm453_vm1, %v464_v34, %v465_v24  ;;  %v2878_v50 = vsel %vm453_vm1, %v469_v33, %v470_v39 }
  0x59   : > { %v2858_v9 = vsel %vm453_vm1, %v465_v24, %v467_v0  ;;  %v475_v0 = vrot.slane %v2530_v43, 2  ;;  %v474_v24 = vrot.slane %v2538_v48, 2 }
  0x5a   : > { %658 = vrot.lane.b32.xlu1 %v458_v28, %s2400_s21  ;;  %v4216_v28 = vmax.f32 %v2496_v26, 0.0  ;;  %v477_v26 = vrot.slane %v4217_v52, 2 }
  0x5b   : > { %656 = vrot.lane.b32.xlu0 %v456_v61, %s2400_s21  ;;  %v2892_v52 = vsel %vm453_vm1, %v474_v24, %v475_v0 }
  0x5c   : > { %v472_v17 = vrot.slane %v4216_v28, 2  ;;  %v2886_v34 = vsel %vm453_vm1, %v475_v0, %v477_v26  ;;  %v480_v28 = vrot.slane %v2546_v51, 2  ;;  %v485_v26 = vrot.slane %v2578_v1, 2 }
  0x5d   : > { %v484_v0 = vrot.slane %v2589_v14, 2 }
  0x5e   : > { %662 = vrot.lane.b32.xlu1 %v2844_v62, %s2400_s21  ;;  %v2872_v61 = vsel %vm453_vm1, %v470_v39, %v472_v17  ;;  %v4218_v17 = vmax.f32 %v2541_v49, 0.0  ;;  %v479_v39 = vrot.slane %v2561_v58, 2  ;;  %v487_v49 = vrot.slane %v4219_v22, 2 }
  0x5f   : > { %660 = vrot.lane.b32.xlu0 %v2850_v7, %s2400_s21  ;;  %v2920_v22 = vsel %vm453_vm1, %v484_v0, %v485_v26 }
  0x60   : > { %v482_v38 = vrot.slane %v4218_v17, 2  ;;  %v2906_v17 = vsel %vm453_vm1, %v479_v39, %v480_v28  ;;  %v2914_v24 = vsel %vm453_vm1, %v485_v26, %v487_v49  ;;  %4222 = vst [vmem:[#allocation37_spill] sm:$0xff] %v2920_v22  ;;  %v495_v49 = vrot.slane %v2626_v45, 2 }
  0x61   : > { %4220 = vst [vmem:[#allocation36_spill] sm:$0xff] %v2914_v24  ;;  %v494_v26 = vrot.slane %v2633_v54, 2 }
  0x62   : > { %666 = vrot.lane.b32.xlu1 %v2858_v9, %s2400_s21  ;;  %v2900_v33 = vsel %vm453_vm1, %v480_v28, %v482_v38  ;;  %v490_v38 = vrot.slane %v2594_v18, 2  ;;  %v489_v28 = vrot.slane %v2609_v32, 2  ;;  %v2942_v0 = vsel %vm453_vm1, %v495_v49, %v497_v11 }
  0x63   : > { %664 = vrot.lane.b32.xlu0 %v2864_v10, %s2400_s21  ;;  %4226 = vst [vmem:[#allocation40_spill] sm:$0xff] %v2942_v0  ;;  %v2948_v8 = vsel %vm453_vm1, %v494_v26, %v495_v49  ;;  %v505_v11 = vrot.slane %v2666_v57, 2  ;;  %v504_v49 = vrot.slane %v2681_v2, 2 }
  0x64   : > { %v2928_v39 = vsel %vm453_vm1, %v490_v38, %v492_v60  ;;  %v2934_v63 = vsel %vm453_vm1, %v489_v28, %v490_v38  ;;  %v500_v60 = vrot.slane %v2651_v15, 2  ;;  %4228 = vst [vmem:[#allocation41_spill] sm:$0xff] %v2948_v8  ;;  %v499_v38 = vrot.slane %v2661_v37, 2 }
  0x65   : > { %4223 = vst [vmem:[#allocation38_spill] sm:$0xff] %v2928_v39  ;;  %4225 = vst [vmem:[#allocation39_spill] sm:$0xff] %v2934_v63 }
  0x66   : > { %670 = vrot.lane.b32.xlu1 %v2872_v61, %s2400_s21  ;;  %v2956_v28 = vsel %vm453_vm1, %v500_v60, %v502_v35  ;;  %v2962_v6 = vsel %vm453_vm1, %v499_v38, %v500_v60  ;;  %v510_v35 = vrot.slane %v2698_v40, 2  ;;  %v509_v60 = vrot.slane %v2705_v16, 2 }
  0x67   : > { %668 = vrot.lane.b32.xlu0 %v2878_v50, %s2400_s21  ;;  %4229 = vst [vmem:[#allocation42_spill] sm:$0xff] %v2956_v28  ;;  %4231 = vst [vmem:[#allocation43_spill] sm:$0xff] %v2962_v6 }
  0x6a   : > { %674 = vrot.lane.b32.xlu1 %v2886_v34, %s2400_s21 }
  0x6b   : > { %672 = vrot.lane.b32.xlu0 %v2892_v52, %s2400_s21 }
  0x6e   : > { %678 = vrot.lane.b32.xlu1 %v2900_v33, %s2400_s21 }
  0x6f   : > { %676 = vrot.lane.b32.xlu0 %v2906_v17, %s2400_s21 }
  0x72   : > { %682 = vrot.lane.b32.xlu1 %v2914_v24, %s2400_s21 }
  0x73   : > { %680 = vrot.lane.b32.xlu0 %v2920_v22, %s2400_s21 }
  0x76   : > { %686 = vrot.lane.b32.xlu1 %v2928_v39, %s2400_s21  ;;  %v4230_v39 = vmax.f32 %v2655_v27, 0.0 }
  0x77   : > { %684 = vrot.lane.b32.xlu0 %v2934_v63, %s2400_s21 }
  0x78   : > { %v507_v59 = vrot.slane %v4230_v39, 2  ;;  %v2976_v39 = vsel %vm453_vm1, %v504_v49, %v505_v11 }
  0x79   : > { %4234 = vst [vmem:[#allocation45_spill] sm:$0xff] %v2976_v39 }
  0x7a   : > { %690 = vrot.lane.b32.xlu1 %v2942_v0, %s2400_s21  ;;  %v2970_v26 = vsel %vm453_vm1, %v505_v11, %v507_v59  ;;  %v4233_v0 = vmax.f32 %v2685_v44, 0.0  ;;  %v515_v59 = vrot.slane %v2723_v13, 2  ;;  %v514_v11 = vrot.slane %v2733_v21, 2 }
  0x7b   : > { %688 = vrot.lane.b32.xlu0 %v2948_v8, %s2400_s21  ;;  %4232 = vst [vmem:[#allocation44_spill] sm:$0xff] %v2970_v26 }
  0x7c   : > { %v512_v27 = vrot.slane %v4233_v0, 2  ;;  %v2990_v0 = vsel %vm453_vm1, %v509_v60, %v510_v35 }
  0x7d   : > { %4237 = vst [vmem:[#allocation47_spill] sm:$0xff] %v2990_v0 }
  0x7e   : > { %694 = vrot.lane.b32.xlu1 %v2956_v28, %s2400_s21  ;;  %v2984_v38 = vsel %vm453_vm1, %v510_v35, %v512_v27  ;;  %v4236_v28 = vmax.f32 %v2709_v19, 0.0  ;;  %v520_v27 = vrot.slane %v2738_v47, 2  ;;  %v519_v35 = vrot.slane %v2753_v55, 2 }
  0x7f   : > { %692 = vrot.lane.b32.xlu0 %v2962_v6, %s2400_s21  ;;  %4235 = vst [vmem:[#allocation46_spill] sm:$0xff] %v2984_v38 }
  0x80   : > { %v517_v44 = vrot.slane %v4236_v28, 2  ;;  %v3004_v28 = vsel %vm453_vm1, %v514_v11, %v515_v59  ;;  %v524_v11 = vrot.slane %v2777_v12, 2 }
  0x81   : > { %4240 = vst [vmem:[#allocation49_spill] sm:$0xff] %v3004_v28 }
  0x82   : > { %698 = vrot.lane.b32.xlu1 %v2970_v26, %s2400_s21  ;;  %v2998_v49 = vsel %vm453_vm1, %v515_v59, %v517_v44  ;;  %v4239_v26 = vmax.f32 %v2727_v31, 0.0  ;;  %v525_v44 = vrot.slane %v2770_v42, 2  ;;  %v3020_v59 = vsel %vm453_vm1, %v519_v35, %v520_v27 }
  0x83   : > { %696 = vrot.lane.b32.xlu0 %v2976_v39, %s2400_s21  ;;  %4238 = vst [vmem:[#allocation48_spill] sm:$0xff] %v2998_v49  ;;  %4244 = vst [vmem:[#allocation52_spill] sm:$0xff] %v3020_v59 }
  0x84   : > { %v522_v19 = vrot.slane %v4239_v26, 2  ;;  %v3038_v35 = vsel %vm453_vm1, %v524_v11, %v525_v44 }
  0x85   : > { %4249 = vst [vmem:[#allocation56_spill] sm:$0xff] %v3038_v35 }
  0x86   : > { %702 = vrot.lane.b32.xlu1 %v2984_v38, %s2400_s21  ;;  %v3012_v60 = vsel %vm453_vm1, %v520_v27, %v522_v19  ;;  %v4242_v38 = vmax.f32 %v2757_v5, 0.0  ;;  %v530_v5 = vrot.slane %v2794_v53, 2 }
  0x87   : > { %700 = vrot.lane.b32.xlu0 %v2990_v0, %s2400_s21  ;;  %4241 = vst [vmem:[#allocation50_spill] sm:$0xff] %v3012_v60 }
  0x88   : > { %v527_v31 = vrot.slane %v4242_v38, 2  ;;  %v4247_v38 = vmax.f32 %v2781_v56, 0.0 }
  0x8a   : > { %706 = vrot.lane.b32.xlu1 %v2998_v49, %s2400_s21  ;;  %v3030_v19 = vsel %vm453_vm1, %v525_v44, %v527_v31  ;;  %v532_v49 = vrot.slane %v4247_v38, 2 }
  0x8b   : > { %704 = vrot.lane.b32.xlu0 %v3004_v28, %s2400_s21  ;;  %4246 = vst [vmem:[#allocation54_spill] sm:$0xff] %v3030_v19  ;;  %v529_v28 = vrot.slane %v2801_v41, 2 }
  0x8c   : > { %v3017_v26 = vpop.permute.xlu1 %564  ;;  %v3048_v31 = vsel %vm453_vm1, %v530_v5, %v532_v49 }
  0x8d   : > { %4243 = vst [vmem:[#allocation51_spill] sm:$0xff] %v3017_v26  ;;  %v3023_v0 = vpop.permute.xlu0 %560  ;;  %4251 = vst [vmem:[#allocation58_spill] sm:$0xff] %v3048_v31  ;;  %v3053_v38 = vsel %vm453_vm1, %v529_v28, %v530_v5  ;;  %v1593_v26 = vld [vmem:[%s4059_s1 + $0x8] sm:$0xff] }
  0x8e   : > { %4245 = vst [vmem:[#allocation53_spill] sm:$0xff] %v3023_v0  ;;  %710 = vrot.lane.b32.xlu1 %v3012_v60, %s2400_s21  ;;  %4253 = vst [vmem:[#allocation60_spill] sm:$0xff] %v3053_v38 }
  0x8f   : > { %708 = vrot.lane.b32.xlu0 %v3020_v59, %s2400_s21 }
  0x90   : > { %v3035_v27 = vpop.permute.xlu1 %566 }
  0x91   : > { %4248 = vst [vmem:[#allocation55_spill] sm:$0xff] %v3035_v27  ;;  %v3041_v39 = vpop.permute.xlu0 %562 }
  0x92   : > { %4250 = vst [vmem:[#allocation57_spill] sm:$0xff] %v3041_v39  ;;  %714 = vrot.lane.b32.xlu1 %v3030_v19, %s2400_s21 }
  0x93   : > { %712 = vrot.lane.b32.xlu0 %v3038_v35, %s2400_s21 }
  0x94   : > { %v3050_v56 = vpop.permute.xlu1 %570 }
  0x95   : > { %4252 = vst [vmem:[#allocation59_spill] sm:$0xff] %v3050_v56  ;;  %v3055_v44 = vpop.permute.xlu0 %568 }
  0x96   : > { %4254 = vst [vmem:[#allocation61_spill] sm:$0xff] %v3055_v44  ;;  %718 = vrot.lane.b32.xlu1 %v3048_v31, %s2400_s21 }
  0x97   : > { %716 = vrot.lane.b32.xlu0 %v3053_v38, %s2400_s21 }
  0x98   : > { %v3061_v11 = vpop.permute.xlu1 %574 }
  0x99   : > { %v3063_v19 = vpop.permute.xlu0 %572 }
  0x9a   : > { %4255 = vst [vmem:[#allocation62_spill] sm:$0xff] %v3063_v19  ;;  %754 = vrot.lane.b32.xlu1 %v2458_v4, %s2401_s22 }
  0x9b   : > { %752 = vrot.lane.b32.xlu0 %v2456_v3, %s2401_s22  ;;  %v1592_v3 = vld [vmem:[%s4059_s1] sm:$0xff] }
  0x9c   : > { %v3069_v49 = vpop.permute.xlu1 %578  ;;  %v2328_v8 = vpack.c.bf16 %v1593_v26, %v1592_v3 }
  0x9d   : > { %v3071_v28 = vpop.permute.xlu0 %576 }
  0x9e   : > { %758 = vrot.lane.b32.xlu1 %v2484_v20, %s2401_s22  ;;  %2329 = vmatprep.subr.bf16.mxu0 %v2328_v8 }
  0x9f   : > { %756 = vrot.lane.b32.xlu0 %v2493_v25, %s2401_s22  ;;  %2336 = vmatprep.subr.bf16.mxu1 %v2328_v8 }
  0xa0   : > { %v3077_v5 = vpop.permute.xlu1 %582  ;;  %2331 = vmatpush3.bf16.msra.mxu0 %v2328_v8  ;;  %2339 = vmatpush3.bf16.msra.mxu1 %v2328_v8 }
  0xa1   : > { %v3079_v31 = vpop.permute.xlu0 %580 }
  0xa2   : > { %762 = vrot.lane.b32.xlu1 %v2502_v29, %s2401_s22 }
  0xa3   : > { %760 = vrot.lane.b32.xlu0 %v2514_v36, %s2401_s22 }
  0xa4   : > { %v3085_v38 = vpop.permute.xlu1 %586 }
  0xa5   : > { %v3087_v35 = vpop.permute.xlu0 %584 }
  0xa6   : > { %766 = vrot.lane.b32.xlu1 %v2530_v43, %s2401_s22 }
  0xa7   : > { %764 = vrot.lane.b32.xlu0 %v2538_v48, %s2401_s22 }
  0xa8   : > { %v3093_v60 = vpop.permute.xlu1 %590 }
  0xa9   : > { %v3095_v59 = vpop.permute.xlu0 %588 }
  0xaa   : > { %770 = vrot.lane.b32.xlu1 %v2546_v51, %s2401_s22 }
  0xab   : > { %768 = vrot.lane.b32.xlu0 %v2561_v58, %s2401_s22 }
  0xac   : > { %v3101_v19 = vpop.permute.xlu1 %594 }
  0xad   : > { %v3103_v56 = vpop.permute.xlu0 %592 }
  0xae   : > { %774 = vrot.lane.b32.xlu1 %v2578_v1, %s2401_s22 }
  0xaf   : > { %772 = vrot.lane.b32.xlu0 %v2589_v14, %s2401_s22 }
  0xb0   : > { %v3109_v6 = vpop.permute.xlu1 %598 }
  0xb1   : > { %v3111_v44 = vpop.permute.xlu0 %596 }
  0xb2   : > { %778 = vrot.lane.b32.xlu1 %v2594_v18, %s2401_s22 }
  0xb3   : > { %776 = vrot.lane.b32.xlu0 %v2609_v32, %s2401_s22 }
  0xb4   : > { %v3117_v4 = vpop.permute.xlu1 %602 }
  0xb5   : > { %v3119_v27 = vpop.permute.xlu0 %600 }
  0xb6   : > { %850 = vrot.lane.b32.xlu1 %v2506_v30, %s2402_s23  ;;  %v1594_v30 = vld [vmem:[%s4059_s1 + $0x10] sm:$0xff] }
  0xb7   : > { %848 = vrot.lane.b32.xlu0 %v2489_v23, %s2402_s23  ;;  %v1595_v23 = vld [vmem:[%s4059_s1 + $0x18] sm:$0xff] }
  0xb8   : > { %v3131_v39 = vpop.permute.xlu1 %606  ;;  %v2332_v3 = vpack.c.bf16 %v1595_v23, %v1594_v30 }
  0xb9   : > { %v3133_v0 = vpop.permute.xlu0 %604 }
  0xba   : > { %946 = vrot.lane.b32.xlu1 %v2844_v62, %s2403_s28  ;;  %2333 = vmatprep.subr.bf16.mxu0 %v2332_v3  ;;  %v1596_v62 = vld [vmem:[%s4059_s1 + $0x20] sm:$0xf] }
  0xbb   : > { %944 = vrot.lane.b32.xlu0 %v2850_v7, %s2403_s28  ;;  %2337 = vmatprep.subr.bf16.mxu1 %v2332_v3 }
  0xbc   : > { %v3145_v26 = vpop.permute.xlu1 %610  ;;  %2335 = vmatpush3.bf16.msra.mxu0 %v2332_v3  ;;  %2340 = vmatpush3.bf16.msra.mxu1 %v2332_v3  ;;  %v4256_v3 = vld [vmem:[#allocation9_spill] sm:$0xff] }
  0xbd   : > { %v3147_v63 = vpop.permute.xlu0 %608  ;;  %2278 = vmatprep.subr.msk.mxu0 %vm1694_vm2, %v1596_v62  ;;  %2338 = vmatprep.subr.msk.mxu1 %vm1694_vm2, %v1596_v62 }
  0xbe   : > { %1042 = vrot.lane.b32.xlu1 %v2484_v20, %s2404_s6 }
  0xbf   : > { %1040 = vrot.lane.b32.xlu0 %v2493_v25, %s2404_s6 }
  0xc0   : > { %v3156_v7 = vpop.permute.xlu1 %614  ;;  %2279 = vmatpush3.msk.msra.mxu0 %vm1694_vm2, %v1596_v62  ;;  %2341 = vmatpush3.msk.msra.mxu1 %vm1694_vm2, %v1596_v62 }
  0xc1   : > { %v3158_v8 = vpop.permute.xlu0 %612 }
  0xc2   : > { %852 = vrot.lane.b32.xlu1 %v2535_v46, %s2402_s23 }
  0xc3   : > { %1136 = vrot.lane.b32.xlu0 %v2535_v46, %s2405_s9 }
  0xc4   : > { %v3164_v30 = vpop.permute.xlu1 %618 }
  0xc5   : > { %v3166_v23 = vpop.permute.xlu0 %616 }
  0xc6   : > { %1232 = vrot.lane.b32.xlu1 %v2864_v10, %s2406_s10 }
  0xc7   : > { %1138 = vrot.lane.b32.xlu0 %v4256_v3, %s2405_s9 }
  0xc8   : > { %v3172_v20 = vpop.permute.xlu1 %622 }
  0xc9   : > { %v3174_v25 = vpop.permute.xlu0 %620 }
  0xca   : > { %948 = vrot.lane.b32.xlu1 %v2864_v10, %s2403_s28 }
  0xcb   : > { %854 = vrot.lane.b32.xlu0 %v4256_v3, %s2402_s23 }
  0xcc   : > { %v3180_v46 = vpop.permute.xlu1 %658 }
  0xcd   : > { %4257 = vst [vmem:[#allocation9_spill] sm:$0xff] %v3180_v46  ;;  %v3182_v62 = vpop.permute.xlu0 %656  ;;  %v4262_v46 = vld [vmem:[#allocation11_spill] sm:$0xff] }
  0xce   : > { %950 = vrot.lane.b32.xlu1 %v2858_v9, %s2403_s28 }
  0xcf   : > { %1234 = vrot.lane.b32.xlu0 %v2858_v9, %s2406_s10  ;;  %v1336_v9 = vsel %vm1328_vm3, %v2502_v29, %v3061_v11 }
  0xd0   : > { %v3188_v24 = vpop.permute.xlu1 %662 }
  0xd1   : > { %4258 = vst [vmem:[#allocation63_spill] sm:$0xff] %v3188_v24  ;;  %v3190_v22 = vpop.permute.xlu0 %660 }
  0xd2   : > { %4259 = vst [vmem:[#allocation64_spill] sm:$0xff] %v3190_v22  ;;  %1046 = vrot.lane.b32.xlu1 %v2502_v29, %s2404_s6  ;;  %v1337_v29 = vsel %vm1328_vm3, %v2538_v48, %v3071_v28  ;;  %v1339_v28 = vsel %vm1328_vm3, %v2561_v58, %v3079_v31 }
  0xd3   : > { %1044 = vrot.lane.b32.xlu0 %v2514_v36, %s2404_s6 }
  0xd4   : > { %v3196_v10 = vpop.permute.xlu1 %666 }
  0xd5   : > { %4260 = vst [vmem:[#allocation65_spill] sm:$0xff] %v3196_v10  ;;  %v3198_v3 = vpop.permute.xlu0 %664  ;;  %v4264_v10 = vld [vmem:[#allocation10_spill] sm:$0xff] }
  0xd6   : > { %4261 = vst [vmem:[#allocation66_spill] sm:$0xff] %v3198_v3  ;;  %856 = vrot.lane.b32.xlu1 %v4262_v46, %s2402_s23 }
  0xd7   : > { %1140 = vrot.lane.b32.xlu0 %v4262_v46, %s2405_s9  ;;  %v1338_v46 = vsel %vm1328_vm3, %v2530_v43, %v3069_v49  ;;  %v1340_v49 = vsel %vm1328_vm3, %v2546_v51, %v3077_v5 }
  0xd8   : > { %v671_v24 = vpop.permute.xlu1 %670 }
  0xd9   : > { %v3208_v22 = vsel %vm1361_vm4, %v1336_v9, %v671_v24  ;;  %v3210_v36 = vpop.permute.xlu0 %668 }
  0xda   : > { %4263 = vst [vmem:[#allocation11_spill] sm:$0xff] %v3208_v22  ;;  %1236 = vrot.lane.b32.xlu1 %v2878_v50, %s2406_s10 }
  0xdb   : > { %1142 = vrot.lane.b32.xlu0 %v4264_v10, %s2405_s9 }
  0xdc   : > { %v675_v3 = vpop.permute.xlu1 %674 }
  0xdd   : > { %v3223_v24 = vsel %vm1361_vm4, %v1338_v46, %v675_v3  ;;  %v673_v11 = vpop.permute.xlu0 %672 }
  0xde   : > { %v3226_v9 = vsel %vm1361_vm4, %v1337_v29, %v673_v11  ;;  %952 = vrot.lane.b32.xlu1 %v2878_v50, %s2403_s28  ;;  %v1342_v50 = vsel %vm1328_vm3, %v2578_v1, %v3085_v38 }
  0xdf   : > { %858 = vrot.lane.b32.xlu0 %v4264_v10, %s2402_s23 }
  0xe0   : > { %v679_v22 = vpop.permute.xlu1 %678 }
  0xe1   : > { %v3239_v3 = vsel %vm1361_vm4, %v1340_v49, %v679_v22  ;;  %v677_v46 = vpop.permute.xlu0 %676  ;;  %v1341_v22 = vsel %vm1328_vm3, %v2589_v14, %v3087_v35  ;;  %v1343_v35 = vsel %vm1328_vm3, %v2609_v32, %v3095_v59  ;;  %v1345_v59 = vsel %vm1328_vm3, %v2633_v54, %v3103_v56 }
  0xe2   : > { %v3242_v29 = vsel %vm1361_vm4, %v1339_v28, %v677_v46  ;;  %954 = vrot.lane.b32.xlu1 %v2872_v61, %s2403_s28  ;;  %v1347_v56 = vsel %vm1328_vm3, %v2661_v37, %v3111_v44  ;;  %v1349_v44 = vsel %vm1328_vm3, %v2681_v2, %v3119_v27  ;;  %v1351_v27 = vsel %vm1328_vm3, %v2705_v16, %v3133_v0 }
  0xe3   : > { %1238 = vrot.lane.b32.xlu0 %v2872_v61, %s2406_s10  ;;  %v1344_v61 = vsel %vm1328_vm3, %v2594_v18, %v3093_v60  ;;  %v1353_v0 = vsel %vm1328_vm3, %v2733_v21, %v3147_v63  ;;  %v1355_v63 = vsel %vm1328_vm3, %v2753_v55, %v3158_v8  ;;  %v1357_v8 = vsel %vm1328_vm3, %v2777_v12, %v3166_v23 }
  0xe4   : > { %v683_v5 = vpop.permute.xlu1 %682  ;;  %v1359_v23 = vsel %vm1328_vm3, %v2801_v41, %v3174_v25 }
  0xe5   : > { %v3255_v31 = vsel %vm1361_vm4, %v1342_v50, %v683_v5  ;;  %v681_v10 = vpop.permute.xlu0 %680 }
  0xe6   : > { %v3258_v11 = vsel %vm1361_vm4, %v1341_v22, %v681_v10  ;;  %1050 = vrot.lane.b32.xlu1 %v2530_v43, %s2404_s6  ;;  %v4265_v43 = vld [vmem:[#allocation13_spill] sm:$0xff]  ;;  %v4266_v10 = vld [vmem:[#allocation12_spill] sm:$0xff] }
  0xe7   : > { %1048 = vrot.lane.b32.xlu0 %v2538_v48, %s2404_s6  ;;  %v1346_v48 = vsel %vm1328_vm3, %v2626_v45, %v3101_v19  ;;  %v1348_v19 = vsel %vm1328_vm3, %v2651_v15, %v3109_v6  ;;  %v1350_v6 = vsel %vm1328_vm3, %v2666_v57, %v3117_v4  ;;  %v1352_v4 = vsel %vm1328_vm3, %v2698_v40, %v3131_v39 }
  0xe8   : > { %v687_v38 = vpop.permute.xlu1 %686 }
  0xe9   : > { %v3271_v49 = vsel %vm1361_vm4, %v1344_v61, %v687_v38  ;;  %v685_v28 = vpop.permute.xlu0 %684 }
  0xea   : > { %v3274_v46 = vsel %vm1361_vm4, %v1343_v35, %v685_v28  ;;  %860 = vrot.lane.b32.xlu1 %v4265_v43, %s2402_s23 }
  0xeb   : > { %1144 = vrot.lane.b32.xlu0 %v4265_v43, %s2405_s9 }
  0xec   : > { %v691_v60 = vpop.permute.xlu1 %690 }
  0xed   : > { %v3287_v50 = vsel %vm1361_vm4, %v1346_v48, %v691_v60  ;;  %v689_v5 = vpop.permute.xlu0 %688 }
  0xee   : > { %v3290_v22 = vsel %vm1361_vm4, %v1345_v59, %v689_v5  ;;  %1240 = vrot.lane.b32.xlu1 %v2892_v52, %s2406_s10 }
  0xef   : > { %1146 = vrot.lane.b32.xlu0 %v4266_v10, %s2405_s9 }
  0xf0   : > { %v695_v61 = vpop.permute.xlu1 %694 }
  0xf1   : > { %v3303_v38 = vsel %vm1361_vm4, %v1348_v19, %v695_v61  ;;  %v693_v35 = vpop.permute.xlu0 %692 }
  0xf2   : > { %v3306_v28 = vsel %vm1361_vm4, %v1347_v56, %v693_v35  ;;  %956 = vrot.lane.b32.xlu1 %v2892_v52, %s2403_s28 }
  0xf3   : > { %862 = vrot.lane.b32.xlu0 %v4266_v10, %s2402_s23 }
  0xf4   : > { %v699_v43 = vpop.permute.xlu1 %698 }
  0xf5   : > { %v3319_v48 = vsel %vm1361_vm4, %v1350_v6, %v699_v43  ;;  %v697_v60 = vpop.permute.xlu0 %696 }
  0xf6   : > { %v3322_v59 = vsel %vm1361_vm4, %v1349_v44, %v697_v60  ;;  %958 = vrot.lane.b32.xlu1 %v2886_v34, %s2403_s28  ;;  %v4271_v60 = vld [vmem:[#allocation14_spill] sm:$0xff] }
  0xf7   : > { %1242 = vrot.lane.b32.xlu0 %v2886_v34, %s2406_s10  ;;  %v1354_v34 = vsel %vm1328_vm3, %v2723_v13, %v3145_v26 }
  0xf8   : > { %v703_v52 = vpop.permute.xlu1 %702 }
  0xf9   : > { %v3335_v5 = vsel %vm1361_vm4, %v1352_v4, %v703_v52  ;;  %v701_v10 = vpop.permute.xlu0 %700 }
  0xfa   : > { %v3338_v19 = vsel %vm1361_vm4, %v1351_v27, %v701_v10  ;;  %1054 = vrot.lane.b32.xlu1 %v2546_v51, %s2404_s6  ;;  %v4268_v51 = vld [vmem:[#allocation15_spill] sm:$0xff] }
  0xfb   : > { %1052 = vrot.lane.b32.xlu0 %v2561_v58, %s2404_s6  ;;  %v1356_v58 = vsel %vm1328_vm3, %v2738_v47, %v3156_v7  ;;  %v1358_v7 = vsel %vm1328_vm3, %v2770_v42, %v3164_v30  ;;  %v1360_v30 = vsel %vm1328_vm3, %v2794_v53, %v3172_v20 }
  0xfc   : > { %v707_v39 = vpop.permute.xlu1 %706 }
  0xfd   : > { %v3351_v61 = vsel %vm1361_vm4, %v1354_v34, %v707_v39  ;;  %v705_v56 = vpop.permute.xlu0 %704 }
  0xfe   : > { %4267 = vst [vmem:[#allocation10_spill] sm:$0xff] %v3351_v61  ;;  %v3354_v35 = vsel %vm1361_vm4, %v1353_v0, %v705_v56  ;;  %864 = vrot.lane.b32.xlu1 %v4268_v51, %s2402_s23 }
  0xff   : > { %1148 = vrot.lane.b32.xlu0 %v4268_v51, %s2405_s9 }
 0x100   : > { %v711_v26 = vpop.permute.xlu1 %710 }
 0x101   : > { %v3367_v6 = vsel %vm1361_vm4, %v1356_v58, %v711_v26  ;;  %v709_v43 = vpop.permute.xlu0 %708  ;;  %v4276_v58 = vld [vmem:[#allocation17_spill] sm:$0xff] }
 0x102   : > { %4269 = vst [vmem:[#allocation13_spill] sm:$0xff] %v3367_v6  ;;  %v3370_v44 = vsel %vm1361_vm4, %v1355_v63, %v709_v43  ;;  %1244 = vrot.lane.b32.xlu1 %v2906_v17, %s2406_s10  ;;  %v4277_v63 = vld [vmem:[#allocation37_spill] sm:$0xff] }
 0x103   : > { %4270 = vst [vmem:[#allocation12_spill] sm:$0xff] %v3370_v44  ;;  %1150 = vrot.lane.b32.xlu0 %v4271_v60, %s2405_s9 }
 0x104   : > { %v715_v4 = vpop.permute.xlu1 %714 }
 0x105   : > { %v3383_v52 = vsel %vm1361_vm4, %v1358_v7, %v715_v4  ;;  %v713_v27 = vpop.permute.xlu0 %712  ;;  %v4279_v4 = vld [vmem:[#allocation36_spill] sm:$0xff] }
 0x106   : > { %4272 = vst [vmem:[#allocation15_spill] sm:$0xff] %v3383_v52  ;;  %v3386_v10 = vsel %vm1361_vm4, %v1357_v8, %v713_v27  ;;  %960 = vrot.lane.b32.xlu1 %v2906_v17, %s2403_s28 }
 0x107   : > { %4273 = vst [vmem:[#allocation14_spill] sm:$0xff] %v3386_v10  ;;  %866 = vrot.lane.b32.xlu0 %v4271_v60, %s2402_s23  ;;  %v4285_v10 = vld [vmem:[#allocation38_spill] sm:$0xff] }
 0x108   : > { %v719_v34 = vpop.permute.xlu1 %718 }
 0x109   : > { %v3399_v39 = vsel %vm1361_vm4, %v1360_v30, %v719_v34  ;;  %v717_v0 = vpop.permute.xlu0 %716 }
 0x10a   : > { %4274 = vst [vmem:[#allocation67_spill] sm:$0xff] %v3399_v39  ;;  %v3402_v56 = vsel %vm1361_vm4, %v1359_v23, %v717_v0  ;;  %962 = vrot.lane.b32.xlu1 %v2900_v33, %s2403_s28  ;;  %v4280_v23 = vld [vmem:[#allocation19_spill] sm:$0xff]  ;;  %v4284_v39 = vld [vmem:[#allocation4_spill] sm:$0xff] }
 0x10b   : > { %4275 = vst [vmem:[#allocation68_spill] sm:$0xff] %v3402_v56  ;;  %1246 = vrot.lane.b32.xlu0 %v2900_v33, %s2406_s10 }
 0x10c   : > { %v3408_v17 = vpop.permute.xlu1 %754 }
 0x10d   : > { %v753_v20 = vpop.permute.xlu0 %752 }
 0x10e   : > { %1058 = vrot.lane.b32.xlu1 %v2578_v1, %s2404_s6  ;;  %v4278_v1 = vld [vmem:[#allocation16_spill] sm:$0xff] }
 0x10f   : > { %1056 = vrot.lane.b32.xlu0 %v2589_v14, %s2404_s6 }
 0x110   : > { %v3414_v25 = vpop.permute.xlu1 %758 }
 0x111   : > { %v3416_v51 = vpop.permute.xlu0 %756 }
 0x112   : > { %868 = vrot.lane.b32.xlu1 %v4276_v58, %s2402_s23 }
 0x113   : > { %1152 = vrot.lane.b32.xlu0 %v4276_v58, %s2405_s9 }
 0x114   : > { %v3422_v33 = vpop.permute.xlu1 %762 }
 0x115   : > { %v3424_v26 = vpop.permute.xlu0 %760 }
 0x116   : > { %1248 = vrot.lane.b32.xlu1 %v4277_v63, %s2406_s10 }
 0x117   : > { %1154 = vrot.lane.b32.xlu0 %v4278_v1, %s2405_s9 }
 0x118   : > { %v3430_v14 = vpop.permute.xlu1 %766 }
 0x119   : > { %v3432_v43 = vpop.permute.xlu0 %764 }
 0x11a   : > { %964 = vrot.lane.b32.xlu1 %v4277_v63, %s2403_s28  ;;  %v4281_v63 = vld [vmem:[#allocation39_spill] sm:$0xff] }
 0x11b   : > { %870 = vrot.lane.b32.xlu0 %v4278_v1, %s2402_s23 }
 0x11c   : > { %v3438_v60 = vpop.permute.xlu1 %770 }
 0x11d   : > { %v3440_v7 = vpop.permute.xlu0 %768 }
 0x11e   : > { %966 = vrot.lane.b32.xlu1 %v4279_v4, %s2403_s28 }
 0x11f   : > { %1250 = vrot.lane.b32.xlu0 %v4279_v4, %s2406_s10 }
 0x120   : > { %v3446_v8 = vpop.permute.xlu1 %774 }
 0x121   : > { %v3448_v27 = vpop.permute.xlu0 %772 }
 0x122   : > { %1062 = vrot.lane.b32.xlu1 %v2594_v18, %s2404_s6  ;;  %v4282_v18 = vld [vmem:[#allocation18_spill] sm:$0xff] }
 0x123   : > { %1060 = vrot.lane.b32.xlu0 %v2609_v32, %s2404_s6 }
 0x124   : > { %v3454_v30 = vpop.permute.xlu1 %778 }
 0x125   : > { %v3456_v34 = vpop.permute.xlu0 %776 }
 0x126   : > { %872 = vrot.lane.b32.xlu1 %v4280_v23, %s2402_s23 }
 0x127   : > { %1156 = vrot.lane.b32.xlu0 %v4280_v23, %s2405_s9  ;;  %v4283_v23 = vld [vmem:[#allocation53_spill] sm:$0xff] }
 0x128   : > { %v851_v0 = vpop.permute.xlu1 %850  ;;  %v1329_v52 = vsel %vm1328_vm3, %v4284_v39, %v4283_v23 }
 0x129   : > { %v849_v58 = vpop.permute.xlu0 %848  ;;  %v1362_v6 = vsel %vm1361_vm4, %v1329_v52, %v3182_v62 }
 0x12a   : > { %1252 = vrot.lane.b32.xlu1 %v4281_v63, %s2406_s10 }
 0x12b   : > { %1158 = vrot.lane.b32.xlu0 %v4282_v18, %s2405_s9 }
 0x12c   : > { %v947_v1 = vpop.permute.xlu1 %946 }
 0x12d   : > { %v945_v32 = vpop.permute.xlu0 %944 }
 0x12e   : > { %968 = vrot.lane.b32.xlu1 %v4281_v63, %s2403_s28  ;;  %v1395_v63 = vsel %vm1394_vm5, %v1362_v6, %v753_v20 }
 0x12f   : > { %874 = vrot.lane.b32.xlu0 %v4282_v18, %s2402_s23  ;;  %v1428_v44 = vsel %vm1427_vm6, %v1395_v63, %v849_v58  ;;  %v4286_v58 = vld [vmem:[#allocation21_spill] sm:$0xff] }
 0x130   : > { %v1043_v4 = vpop.permute.xlu1 %1042  ;;  %v1461_v39 = vsel %vm1460_vm7, %v1428_v44, %v945_v32  ;;  %v4287_v44 = vld [vmem:[#allocation57_spill] sm:$0xff] }
 0x131   : > { %v1041_v56 = vpop.permute.xlu0 %1040  ;;  %v4288_v32 = vld [vmem:[#allocation5_spill] sm:$0xff] }
 0x132   : > { %970 = vrot.lane.b32.xlu1 %v4285_v10, %s2403_s28  ;;  %v1494_v62 = vsel %vm1493_vm8, %v1461_v39, %v1041_v56  ;;  %v1330_v23 = vsel %vm1328_vm3, %v4288_v32, %v4287_v44 }
 0x133   : > { %1254 = vrot.lane.b32.xlu0 %v4285_v10, %s2406_s10 }
 0x134   : > { %v853_v18 = vpop.permute.xlu1 %852 }
 0x135   : > { %v1137_v61 = vpop.permute.xlu0 %1136 }
 0x136   : > { %780 = vrot.lane.b32.xlu1 %v2633_v54, %s2401_s22  ;;  %v1527_v6 = vsel %vm1526_vm9, %v1494_v62, %v1137_v61 }
 0x137   : > { %1064 = vrot.lane.b32.xlu0 %v2633_v54, %s2404_s6  ;;  %v4289_v54 = vld [vmem:[#allocation9_spill] sm:$0xff] }
 0x138   : > { %v1233_v52 = vpop.permute.xlu1 %1232  ;;  %v1363_v56 = vsel %vm1361_vm4, %v1330_v23, %v4289_v54  ;;  %v4292_v54 = vld [vmem:[#allocation51_spill] sm:$0xff] }
 0x139   : > { %v1139_v10 = vpop.permute.xlu0 %1138  ;;  %v1560_v20 = vsel %vm1559_vm10, %v1527_v6, %v1233_v52  ;;  %v1396_v63 = vsel %vm1394_vm5, %v1363_v56, %v3408_v17  ;;  %v4290_v17 = vld [vmem:[#allocation41_spill] sm:$0xff] }
 0x13a   : > { %1160 = vrot.lane.b32.xlu1 %v4286_v58, %s2405_s9  ;;  %2280 = vmatprep.mubr.msk.f32.mxu0 %vm1597_vm11, %v1560_v20  ;;  %v1429_v62 = vsel %vm1427_vm6, %v1396_v63, %v851_v0  ;;  %v4291_v0 = vld [vmem:[#allocation20_spill] sm:$0xff] }
 0x13b   : > { %1066 = vrot.lane.b32.xlu0 %v2626_v45, %s2404_s6  ;;  %v1462_v6 = vsel %vm1460_vm7, %v1429_v62, %v947_v1 }
 0x13c   : > { %v949_v61 = vpop.permute.xlu1 %948  ;;  %v1495_v52 = vsel %vm1493_vm8, %v1462_v6, %v1043_v4 }
 0x13d   : > { %v855_v39 = vpop.permute.xlu0 %854  ;;  %v1528_v44 = vsel %vm1526_vm9, %v1495_v52, %v1139_v10  ;;  %v4294_v10 = vld [vmem:[#allocation64_spill] sm:$0xff] }
 0x13e   : > { %876 = vrot.lane.b32.xlu1 %v4286_v58, %s2402_s23 }
 0x13f   : > { %782 = vrot.lane.b32.xlu0 %v2626_v45, %s2401_s22  ;;  %v4293_v45 = vld [vmem:[#allocation2_spill] sm:$0xff] }
 0x140   : > { %v951_v20 = vpop.permute.xlu1 %950  ;;  %v1331_v4 = vsel %vm1328_vm3, %v4293_v45, %v4292_v54 }
 0x141   : > { %v1235_v32 = vpop.permute.xlu0 %1234  ;;  %v1364_v56 = vsel %vm1361_vm4, %v1331_v4, %v4294_v10 }
 0x142   : > { %v1561_v23 = vsel %vm1559_vm10, %v1528_v44, %v1235_v32  ;;  %1256 = vrot.lane.b32.xlu1 %v4290_v17, %s2406_s10  ;;  %v1397_v63 = vsel %vm1394_vm5, %v1364_v56, %v3416_v51  ;;  %v4295_v32 = vld [vmem:[#allocation40_spill] sm:$0xff] }
 0x143   : > { %1162 = vrot.lane.b32.xlu0 %v4291_v0, %s2405_s9  ;;  %2281 = vmatmul.mubr.msk.f32.vlgmr.msra.gmra.mrb[0].mxu0 %vm1597_vm11, %v1561_v23  ;;  %v1430_v6 = vsel %vm1427_vm6, %v1397_v63, %v853_v18  ;;  %v4296_v18 = vld [vmem:[#allocation55_spill] sm:$0xff] }
 0x144   : > { %v1047_v1 = vpop.permute.xlu1 %1046  ;;  %v1463_v44 = vsel %vm1460_vm7, %v1430_v6, %v949_v61  ;;  %v4297_v61 = vld [vmem:[#allocation3_spill] sm:$0xff] }
 0x145   : > { %v1045_v58 = vpop.permute.xlu0 %1044  ;;  %v1332_v45 = vsel %vm1328_vm3, %v4297_v61, %v4296_v18  ;;  %v4302_v18 = vld [vmem:[#allocation43_spill] sm:$0xff] }
 0x146   : > { %972 = vrot.lane.b32.xlu1 %v4290_v17, %s2403_s28  ;;  %v1496_v23 = vsel %vm1493_vm8, %v1463_v44, %v1045_v58  ;;  %v4298_v58 = vld [vmem:[#allocation63_spill] sm:$0xff] }
 0x147   : > { %878 = vrot.lane.b32.xlu0 %v4291_v0, %s2402_s23  ;;  %v1365_v4 = vsel %vm1361_vm4, %v1332_v45, %v4298_v58  ;;  %v4304_v45 = vld [vmem:[#allocation22_spill] sm:$0xff] }
 0x148   : > { %v857_v62 = vpop.permute.xlu1 %856  ;;  %v1398_v56 = vsel %vm1394_vm5, %v1365_v4, %v3414_v25 }
 0x149   : > { %v1141_v52 = vpop.permute.xlu0 %1140  ;;  %v1431_v6 = vsel %vm1427_vm6, %v1398_v56, %v855_v39 }
 0x14a   : > { %974 = vrot.lane.b32.xlu1 %v4295_v32, %s2403_s28  ;;  %v1529_v17 = vsel %vm1526_vm9, %v1496_v23, %v1141_v52  ;;  %v4299_v52 = vld [vmem:[#allocation23_spill] sm:$0xff]  ;;  %v1464_v44 = vsel %vm1460_vm7, %v1431_v6, %v951_v20  ;;  %v4300_v20 = vld [vmem:[#allocation61_spill] sm:$0xff] }
 0x14b   : > { %1258 = vrot.lane.b32.xlu0 %v4295_v32, %s2406_s10 }
 0x14c   : > { %v1237_v0 = vpop.permute.xlu1 %1236 }
 0x14d   : > { %v1562_v54 = vsel %vm1559_vm10, %v1529_v17, %v1237_v0  ;;  %v1143_v51 = vpop.permute.xlu0 %1142 }
 0x14e   : > { %784 = vrot.lane.b32.xlu1 %v2661_v37, %s2401_s22  ;;  %2283 = vmatprep.mubr.msk.f32.mxu0 %vm1597_vm11, %v1562_v54  ;;  %v4301_v54 = vld [vmem:[#allocation7_spill] sm:$0xff] }
 0x14f   : > { %1068 = vrot.lane.b32.xlu0 %v2661_v37, %s2404_s6  ;;  %v1497_v37 = vsel %vm1493_vm8, %v1464_v44, %v1047_v1  ;;  %v1333_v1 = vsel %vm1328_vm3, %v4301_v54, %v4300_v20 }
 0x150   : > { %v953_v10 = vpop.permute.xlu1 %952  ;;  %v1530_v23 = vsel %vm1526_vm9, %v1497_v37, %v1143_v51  ;;  %v4303_v51 = vld [vmem:[#allocation66_spill] sm:$0xff] }
 0x151   : > { %v859_v63 = vpop.permute.xlu0 %858  ;;  %v1366_v61 = vsel %vm1361_vm4, %v1333_v1, %v4303_v51 }
 0x152   : > { %1164 = vrot.lane.b32.xlu1 %v4299_v52, %s2405_s9 }
 0x153   : > { %1070 = vrot.lane.b32.xlu0 %v2651_v15, %s2404_s6 }
 0x154   : > { %v955_v32 = vpop.permute.xlu1 %954 }
 0x155   : > { %v1239_v17 = vpop.permute.xlu0 %1238 }
 0x156   : > { %v1563_v0 = vsel %vm1559_vm10, %v1530_v23, %v1239_v17  ;;  %880 = vrot.lane.b32.xlu1 %v4299_v52, %s2402_s23  ;;  %v4305_v17 = vld [vmem:[#allocation42_spill] sm:$0xff] }
 0x157   : > { %786 = vrot.lane.b32.xlu0 %v2651_v15, %s2401_s22  ;;  %2284 = vmatmul.mubr.msk.f32.gmra.mrb[2].mxu0 %vm1597_vm11, %v1563_v0  ;;  %v1399_v15 = vsel %vm1394_vm5, %v1366_v61, %v3424_v26 }
 0x158   : > { %v1051_v25 = vpop.permute.xlu1 %1050  ;;  %v1432_v4 = vsel %vm1427_vm6, %v1399_v15, %v857_v62  ;;  %v4306_v62 = vld [vmem:[#allocation59_spill] sm:$0xff] }
 0x159   : > { %v1049_v39 = vpop.permute.xlu0 %1048  ;;  %v1465_v6 = vsel %vm1460_vm7, %v1432_v4, %v953_v10  ;;  %v4307_v10 = vld [vmem:[#allocation6_spill] sm:$0xff] }
 0x15a   : > { %1260 = vrot.lane.b32.xlu1 %v4302_v18, %s2406_s10  ;;  %v1498_v52 = vsel %vm1493_vm8, %v1465_v6, %v1049_v39  ;;  %v1334_v0 = vsel %vm1328_vm3, %v4307_v10, %v4306_v62  ;;  %v4308_v39 = vld [vmem:[#allocation65_spill] sm:$0xff] }
 0x15b   : > { %1166 = vrot.lane.b32.xlu0 %v4304_v45, %s2405_s9  ;;  %v1367_v20 = vsel %vm1361_vm4, %v1334_v0, %v4308_v39  ;;  %v4312_v10 = vld [vmem:[#allocation45_spill] sm:$0xff]  ;;  %v4313_v39 = vld [vmem:[#allocation24_spill] sm:$0xff] }
 0x15c   : > { %v861_v58 = vpop.permute.xlu1 %860  ;;  %v1400_v1 = vsel %vm1394_vm5, %v1367_v20, %v3422_v33  ;;  %v4309_v33 = vld [vmem:[#allocation25_spill] sm:$0xff] }
 0x15d   : > { %v1145_v56 = vpop.permute.xlu0 %1144  ;;  %v1433_v51 = vsel %vm1427_vm6, %v1400_v1, %v859_v63 }
 0x15e   : > { %976 = vrot.lane.b32.xlu1 %v4302_v18, %s2403_s28  ;;  %v1531_v44 = vsel %vm1526_vm9, %v1498_v52, %v1145_v56  ;;  %v1466_v61 = vsel %vm1460_vm7, %v1433_v51, %v955_v32  ;;  %v4310_v52 = vld [vmem:[#allocation62_spill] sm:$0xff] }
 0x15f   : > { %882 = vrot.lane.b32.xlu0 %v4304_v45, %s2402_s23  ;;  %v1499_v45 = vsel %vm1493_vm8, %v1466_v61, %v1051_v25 }
 0x160   : > { %v1241_v37 = vpop.permute.xlu1 %1240 }
 0x161   : > { %v1564_v23 = vsel %vm1559_vm10, %v1531_v44, %v1241_v37  ;;  %v1147_v26 = vpop.permute.xlu0 %1146 }
 0x162   : > { %978 = vrot.lane.b32.xlu1 %v4305_v17, %s2403_s28  ;;  %2286 = vmatprep.mubr.msk.f32.mxu0 %vm1597_vm11, %v1564_v23  ;;  %v1532_v4 = vsel %vm1526_vm9, %v1499_v45, %v1147_v26  ;;  %v4315_v45 = vld [vmem:[#allocation44_spill] sm:$0xff] }
 0x163   : > { %1262 = vrot.lane.b32.xlu0 %v4305_v17, %s2406_s10 }
 0x164   : > { %v957_v54 = vpop.permute.xlu1 %956 }
 0x165   : > { %v863_v18 = vpop.permute.xlu0 %862 }
 0x166   : > { %788 = vrot.lane.b32.xlu1 %v2681_v2, %s2401_s22 }
 0x167   : > { %1072 = vrot.lane.b32.xlu0 %v2681_v2, %s2404_s6  ;;  %v4311_v2 = vld [vmem:[#allocation8_spill] sm:$0xff] }
 0x168   : > { %v959_v15 = vpop.permute.xlu1 %958  ;;  %v1335_v25 = vsel %vm1328_vm3, %v4311_v2, %v4310_v52 }
 0x169   : > { %v1243_v56 = vpop.permute.xlu0 %1242  ;;  %v1368_v44 = vsel %vm1361_vm4, %v1335_v25, %v3210_v36 }
 0x16a   : > { %v1565_v6 = vsel %vm1559_vm10, %v1532_v4, %v1243_v56  ;;  %1168 = vrot.lane.b32.xlu1 %v4309_v33, %s2405_s9  ;;  %v1401_v37 = vsel %vm1394_vm5, %v1368_v44, %v3432_v43 }
 0x16b   : > { %1074 = vrot.lane.b32.xlu0 %v2666_v57, %s2404_s6  ;;  %2287 = vmatmul.mubr.msk.f32.gmra.mrb[4].mxu0 %vm1597_vm11, %v1565_v6  ;;  %v1434_v26 = vsel %vm1427_vm6, %v1401_v37, %v861_v58 }
 0x16c   : > { %v1055_v63 = vpop.permute.xlu1 %1054  ;;  %v1467_v62 = vsel %vm1460_vm7, %v1434_v26, %v957_v54  ;;  %v4314_v54 = vld [vmem:[#allocation11_spill] sm:$0xff] }
 0x16d   : > { %v1053_v32 = vpop.permute.xlu0 %1052  ;;  %v1402_v1 = vsel %vm1394_vm5, %v4314_v54, %v3430_v14 }
 0x16e   : > { %884 = vrot.lane.b32.xlu1 %v4309_v33, %s2402_s23  ;;  %v1500_v0 = vsel %vm1493_vm8, %v1467_v62, %v1053_v32  ;;  %v1435_v61 = vsel %vm1427_vm6, %v1402_v1, %v863_v18 }
 0x16f   : > { %790 = vrot.lane.b32.xlu0 %v2666_v57, %s2401_s22  ;;  %v1468_v4 = vsel %vm1460_vm7, %v1435_v61, %v959_v15  ;;  %v4316_v15 = vld [vmem:[#allocation27_spill] sm:$0xff] }
 0x170   : > { %v865_v23 = vpop.permute.xlu1 %864  ;;  %v1501_v56 = vsel %vm1493_vm8, %v1468_v4, %v1055_v63  ;;  %v1403_v63 = vsel %vm1394_vm5, %v3226_v9, %v3440_v7  ;;  %v4317_v7 = vld [vmem:[#allocation47_spill] sm:$0xff] }
 0x171   : > { %v1149_v17 = vpop.permute.xlu0 %1148  ;;  %v1436_v25 = vsel %vm1427_vm6, %v1403_v63, %v865_v23  ;;  %v4318_v23 = vld [vmem:[#allocation26_spill] sm:$0xff]  ;;  %v4321_v63 = vld [vmem:[#allocation49_spill] sm:$0xff] }
 0x172   : > { %1264 = vrot.lane.b32.xlu1 %v4312_v10, %s2406_s10  ;;  %v1533_v36 = vsel %vm1526_vm9, %v1500_v0, %v1149_v17  ;;  %v1404_v0 = vsel %vm1394_vm5, %v3223_v24, %v3438_v60  ;;  %v4319_v24 = vld [vmem:[#allocation46_spill] sm:$0xff] }
 0x173   : > { %1170 = vrot.lane.b32.xlu0 %v4313_v39, %s2405_s9 }
 0x174   : > { %v1245_v57 = vpop.permute.xlu1 %1244 }
 0x175   : > { %v1566_v20 = vsel %vm1559_vm10, %v1533_v36, %v1245_v57  ;;  %v1151_v43 = vpop.permute.xlu0 %1150 }
 0x176   : > { %980 = vrot.lane.b32.xlu1 %v4312_v10, %s2403_s28  ;;  %2289 = vmatprep.mubr.msk.f32.mxu0 %vm1597_vm11, %v1566_v20  ;;  %v1534_v33 = vsel %vm1526_vm9, %v1501_v56, %v1151_v43 }
 0x177   : > { %886 = vrot.lane.b32.xlu0 %v4313_v39, %s2402_s23 }
 0x178   : > { %v961_v58 = vpop.permute.xlu1 %960 }
 0x179   : > { %v867_v51 = vpop.permute.xlu0 %866 }
 0x17a   : > { %982 = vrot.lane.b32.xlu1 %v4315_v45, %s2403_s28  ;;  %v1437_v39 = vsel %vm1427_vm6, %v1404_v0, %v867_v51  ;;  %v1405_v51 = vsel %vm1394_vm5, %v3242_v29, %v3448_v27 }
 0x17b   : > { %1266 = vrot.lane.b32.xlu0 %v4315_v45, %s2406_s10 }
 0x17c   : > { %v963_v6 = vpop.permute.xlu1 %962 }
 0x17d   : > { %v1247_v32 = vpop.permute.xlu0 %1246  ;;  %v1470_v36 = vsel %vm1460_vm7, %v1437_v39, %v963_v6  ;;  %v4320_v6 = vld [vmem:[#allocation29_spill] sm:$0xff]  ;;  %v4324_v39 = vld [vmem:[#allocation31_spill] sm:$0xff] }
 0x17e   : > { %v1567_v52 = vsel %vm1559_vm10, %v1534_v33, %v1247_v32  ;;  %792 = vrot.lane.b32.xlu1 %v2705_v16, %s2401_s22 }
 0x17f   : > { %1076 = vrot.lane.b32.xlu0 %v2705_v16, %s2404_s6  ;;  %2290 = vmatmul.mubr.msk.f32.gmra.mrb[6].mxu0 %vm1597_vm11, %v1567_v52  ;;  %v1469_v16 = vsel %vm1460_vm7, %v1436_v25, %v961_v58  ;;  %v4322_v25 = vld [vmem:[#allocation28_spill] sm:$0xff] }
 0x180   : > { %v1059_v14 = vpop.permute.xlu1 %1058 }
 0x181   : > { %v1057_v18 = vpop.permute.xlu0 %1056  ;;  %v1503_v57 = vsel %vm1493_vm8, %v1470_v36, %v1059_v14  ;;  %v1406_v14 = vsel %vm1394_vm5, %v3239_v3, %v3446_v8 }
 0x182   : > { %1172 = vrot.lane.b32.xlu1 %v4316_v15, %s2405_s9  ;;  %v1502_v37 = vsel %vm1493_vm8, %v1469_v16, %v1057_v18 }
 0x183   : > { %1078 = vrot.lane.b32.xlu0 %v2698_v40, %s2404_s6 }
 0x184   : > { %v869_v2 = vpop.permute.xlu1 %868 }
 0x185   : > { %v1153_v44 = vpop.permute.xlu0 %1152  ;;  %v1438_v45 = vsel %vm1427_vm6, %v1405_v51, %v869_v2 }
 0x186   : > { %888 = vrot.lane.b32.xlu1 %v4316_v15, %s2402_s23  ;;  %v1535_v26 = vsel %vm1526_vm9, %v1502_v37, %v1153_v44 }
 0x187   : > { %794 = vrot.lane.b32.xlu0 %v2698_v40, %s2401_s22 }
 0x188   : > { %v1249_v17 = vpop.permute.xlu1 %1248 }
 0x189   : > { %v1568_v62 = vsel %vm1559_vm10, %v1535_v26, %v1249_v17  ;;  %v1155_v9 = vpop.permute.xlu0 %1154  ;;  %v4323_v17 = vld [vmem:[#allocation48_spill] sm:$0xff] }
 0x18a   : > { %1268 = vrot.lane.b32.xlu1 %v4317_v7, %s2406_s10  ;;  %2292 = vmatprep.mubr.msk.f32.mxu0 %vm1597_vm11, %v1568_v62  ;;  %v1536_v43 = vsel %vm1526_vm9, %v1503_v57, %v1155_v9 }
 0x18b   : > { %1174 = vrot.lane.b32.xlu0 %v4318_v23, %s2405_s9 }
 0x18c   : > { %v965_v10 = vpop.permute.xlu1 %964 }
 0x18d   : > { %v871_v40 = vpop.permute.xlu0 %870  ;;  %v1471_v56 = vsel %vm1460_vm7, %v1438_v45, %v965_v10 }
 0x18e   : > { %984 = vrot.lane.b32.xlu1 %v4317_v7, %s2403_s28  ;;  %v1439_v15 = vsel %vm1427_vm6, %v1406_v14, %v871_v40  ;;  %v1407_v7 = vsel %vm1394_vm5, %v3258_v11, %v3456_v34  ;;  %v4328_v14 = vld [vmem:[#allocation33_spill] sm:$0xff] }
 0x18f   : > { %890 = vrot.lane.b32.xlu0 %v4318_v23, %s2402_s23 }
 0x190   : > { %v967_v20 = vpop.permute.xlu1 %966 }
 0x191   : > { %v1251_v58 = vpop.permute.xlu0 %1250  ;;  %v1472_v2 = vsel %vm1460_vm7, %v1439_v15, %v967_v20 }
 0x192   : > { %v1569_v54 = vsel %vm1559_vm10, %v1536_v43, %v1251_v58  ;;  %986 = vrot.lane.b32.xlu1 %v4319_v24, %s2403_s28  ;;  %v1408_v43 = vsel %vm1394_vm5, %v3255_v31, %v3454_v30 }
 0x193   : > { %1270 = vrot.lane.b32.xlu0 %v4319_v24, %s2406_s10  ;;  %2293 = vmatmul.mubr.msk.f32.gmra.mrb[8].mxu0 %vm1597_vm11, %v1569_v54  ;;  %v4325_v24 = vld [vmem:[#allocation52_spill] sm:$0xff] }
 0x194   : > { %v1063_v60 = vpop.permute.xlu1 %1062 }
 0x195   : > { %v1061_v1 = vpop.permute.xlu0 %1060  ;;  %v1505_v44 = vsel %vm1493_vm8, %v1472_v2, %v1063_v60 }
 0x196   : > { %796 = vrot.lane.b32.xlu1 %v2733_v21, %s2401_s22  ;;  %v1504_v33 = vsel %vm1493_vm8, %v1471_v56, %v1061_v1  ;;  %v4326_v1 = vld [vmem:[#allocation30_spill] sm:$0xff] }
 0x197   : > { %1080 = vrot.lane.b32.xlu0 %v2733_v21, %s2404_s6  ;;  %v4327_v56 = vld [vmem:[#allocation50_spill] sm:$0xff] }
 0x198   : > { %v873_v61 = vpop.permute.xlu1 %872 }
 0x199   : > { %v1157_v4 = vpop.permute.xlu0 %1156  ;;  %v1440_v10 = vsel %vm1427_vm6, %v1407_v7, %v873_v61  ;;  %v4331_v7 = vld [vmem:[#allocation54_spill] sm:$0xff] }
 0x19a   : > { %1176 = vrot.lane.b32.xlu1 %v4320_v6, %s2405_s9  ;;  %v1537_v21 = vsel %vm1526_vm9, %v1504_v33, %v1157_v4 }
 0x19b   : > { %1082 = vrot.lane.b32.xlu0 %v2723_v13, %s2404_s6 }
 0x19c   : > { %v1253_v32 = vpop.permute.xlu1 %1252 }
 0x19d   : > { %v1570_v52 = vsel %vm1559_vm10, %v1537_v21, %v1253_v32  ;;  %v1159_v29 = vpop.permute.xlu0 %1158 }
 0x19e   : > { %892 = vrot.lane.b32.xlu1 %v4320_v6, %s2402_s23  ;;  %2295 = vmatprep.mubr.msk.f32.mxu0 %vm1597_vm11, %v1570_v52 }
 0x19f   : > { %798 = vrot.lane.b32.xlu0 %v2723_v13, %s2401_s22  ;;  %v1538_v13 = vsel %vm1526_vm9, %v1505_v44, %v1159_v29 }
 0x1a0   : > { %v969_v27 = vpop.permute.xlu1 %968 }
 0x1a1   : > { %v875_v18 = vpop.permute.xlu0 %874  ;;  %v1473_v40 = vsel %vm1460_vm7, %v1440_v10, %v969_v27 }
 0x1a2   : > { %1272 = vrot.lane.b32.xlu1 %v4321_v63, %s2406_s10  ;;  %v1441_v54 = vsel %vm1427_vm6, %v1408_v43, %v875_v18 }
 0x1a3   : > { %1178 = vrot.lane.b32.xlu0 %v4322_v25, %s2405_s9 }
 0x1a4   : > { %v971_v16 = vpop.permute.xlu1 %970 }
 0x1a5   : > { %v1255_v37 = vpop.permute.xlu0 %1254  ;;  %v1474_v60 = vsel %vm1460_vm7, %v1441_v54, %v971_v16 }
 0x1a6   : > { %v1571_v26 = vsel %vm1559_vm10, %v1538_v13, %v1255_v37  ;;  %988 = vrot.lane.b32.xlu1 %v4321_v63, %s2403_s28  ;;  %v4329_v13 = vld [vmem:[#allocation56_spill] sm:$0xff] }
 0x1a7   : > { %894 = vrot.lane.b32.xlu0 %v4322_v25, %s2402_s23  ;;  %2296 = vmatmul.mubr.msk.f32.gmra.mrb[10].mxu0 %vm1597_vm11, %v1571_v26  ;;  %v4330_v26 = vld [vmem:[#allocation32_spill] sm:$0xff] }
 0x1a8   : > { %v781_v3 = vpop.permute.xlu1 %780 }
 0x1a9   : > { %v1065_v8 = vpop.permute.xlu0 %1064  ;;  %v1409_v21 = vsel %vm1394_vm5, %v3274_v46, %v781_v3 }
 0x1aa   : > { %990 = vrot.lane.b32.xlu1 %v4323_v17, %s2403_s28  ;;  %v1506_v36 = vsel %vm1493_vm8, %v1473_v40, %v1065_v8 }
 0x1ab   : > { %1274 = vrot.lane.b32.xlu0 %v4323_v17, %s2406_s10 }
 0x1ac   : > { %v1161_v62 = vpop.permute.xlu1 %1160 }
 0x1ad   : > { %v1067_v9 = vpop.permute.xlu0 %1066 }
 0x1ae   : > { %800 = vrot.lane.b32.xlu1 %v2753_v55, %s2401_s22  ;;  %v1507_v51 = vsel %vm1493_vm8, %v1474_v60, %v1067_v9  ;;  %v4333_v60 = vld [vmem:[#allocation60_spill] sm:$0xff] }
 0x1af   : > { %1084 = vrot.lane.b32.xlu0 %v2753_v55, %s2404_s6  ;;  %v1539_v55 = vsel %vm1526_vm9, %v1506_v36, %v1161_v62 }
 0x1b0   : > { %v877_v23 = vpop.permute.xlu1 %876 }
 0x1b1   : > { %v783_v0 = vpop.permute.xlu0 %782  ;;  %v1442_v52 = vsel %vm1427_vm6, %v1409_v21, %v877_v23  ;;  %v4335_v21 = vld [vmem:[#allocation58_spill] sm:$0xff] }
 0x1b2   : > { %1180 = vrot.lane.b32.xlu1 %v4324_v39, %s2405_s9  ;;  %v1410_v25 = vsel %vm1394_vm5, %v3271_v49, %v783_v0 }
 0x1b3   : > { %1086 = vrot.lane.b32.xlu0 %v2738_v47, %s2404_s6 }
 0x1b4   : > { %v1257_v57 = vpop.permute.xlu1 %1256 }
 0x1b5   : > { %v1572_v20 = vsel %vm1559_vm10, %v1539_v55, %v1257_v57  ;;  %v1163_v11 = vpop.permute.xlu0 %1162  ;;  %v4332_v57 = vld [vmem:[#allocation35_spill] sm:$0xff] }
 0x1b6   : > { %896 = vrot.lane.b32.xlu1 %v4324_v39, %s2402_s23  ;;  %2298 = vmatprep.mubr.msk.f32.mxu0 %vm1597_vm11, %v1572_v20 }
 0x1b7   : > { %802 = vrot.lane.b32.xlu0 %v2738_v47, %s2401_s22  ;;  %v1540_v47 = vsel %vm1526_vm9, %v1507_v51, %v1163_v11  ;;  %v4334_v51 = vld [vmem:[#allocation34_spill] sm:$0xff] }
 0x1b8   : > { %v973_v34 = vpop.permute.xlu1 %972 }
 0x1b9   : > { %v879_v58 = vpop.permute.xlu0 %878  ;;  %v1475_v27 = vsel %vm1460_vm7, %v1442_v52, %v973_v34 }
 0x1ba   : > { %1276 = vrot.lane.b32.xlu1 %v4325_v24, %s2406_s10  ;;  %v1443_v16 = vsel %vm1427_vm6, %v1410_v25, %v879_v58 }
 0x1bb   : > { %1182 = vrot.lane.b32.xlu0 %v4326_v1, %s2405_s9 }
 0x1bc   : > { %v975_v61 = vpop.permute.xlu1 %974 }
 0x1bd   : > { %v1259_v45 = vpop.permute.xlu0 %1258  ;;  %v1476_v37 = vsel %vm1460_vm7, %v1443_v16, %v975_v61 }
 0x1be   : > { %v1573_v4 = vsel %vm1559_vm10, %v1540_v47, %v1259_v45  ;;  %992 = vrot.lane.b32.xlu1 %v4325_v24, %s2403_s28  ;;  %v264_v45 = vld [vmem:[%s2451_s19 + $0x180] sm:$0xff] }
 0x1bf   : > { %898 = vrot.lane.b32.xlu0 %v4326_v1, %s2402_s23  ;;  %2299 = vmatmul.mubr.msk.f32.gmra.mrb[12].mxu0 %vm1597_vm11, %v1573_v4 }
 0x1c0   : > { %v785_v31 = vpop.permute.xlu1 %784 }
 0x1c1   : > { %v1069_v30 = vpop.permute.xlu0 %1068  ;;  %v1411_v0 = vsel %vm1394_vm5, %v3290_v22, %v785_v31 }
 0x1c2   : > { %994 = vrot.lane.b32.xlu1 %v4327_v56, %s2403_s28  ;;  %v1508_v18 = vsel %vm1493_vm8, %v1475_v27, %v1069_v30  ;;  %v318_v30 = vmax.f32 %v264_v45, 0.0 }
 0x1c3   : > { %1278 = vrot.lane.b32.xlu0 %v4327_v56, %s2406_s10 }
 0x1c4   : > { %v1165_v6 = vpop.permute.xlu1 %1164  ;;  %v542_v16 = vrot.slane %v318_v30, 2 }
 0x1c5   : > { %v1071_v33 = vpop.permute.xlu0 %1070  ;;  %v1541_v15 = vsel %vm1526_vm9, %v1508_v18, %v1165_v6 }
 0x1c6   : > { %804 = vrot.lane.b32.xlu1 %v2777_v12, %s2401_s22  ;;  %v1509_v3 = vsel %vm1493_vm8, %v1476_v37, %v1071_v33 }
 0x1c7   : > { %1088 = vrot.lane.b32.xlu0 %v2777_v12, %s2404_s6 }
 0x1c8   : > { %v881_v32 = vpop.permute.xlu1 %880 }
 0x1c9   : > { %v787_v29 = vpop.permute.xlu0 %786  ;;  %v1444_v39 = vsel %vm1427_vm6, %v1411_v0, %v881_v32  ;;  %v537_v32 = vrot.slane %v318_v30, 1 }
 0x1ca   : > { %1184 = vrot.lane.b32.xlu1 %v4328_v14, %s2405_s9  ;;  %v1412_v58 = vsel %vm1394_vm5, %v3287_v50, %v787_v29 }
 0x1cb   : > { %1090 = vrot.lane.b32.xlu0 %v2770_v42, %s2404_s6 }
 0x1cc   : > { %v1261_v12 = vpop.permute.xlu1 %1260 }
 0x1cd   : > { %v1574_v63 = vsel %vm1559_vm10, %v1541_v15, %v1261_v12  ;;  %v1167_v46 = vpop.permute.xlu0 %1166 }
 0x1ce   : > { %900 = vrot.lane.b32.xlu1 %v4328_v14, %s2402_s23  ;;  %2301 = vmatprep.mubr.msk.f32.mxu0 %vm1597_vm11, %v1574_v63  ;;  %v266_v14 = vld [vmem:[%s2451_s19 + $0x190] sm:$0x3] }
 0x1cf   : > { %806 = vrot.lane.b32.xlu0 %v2770_v42, %s2401_s22  ;;  %v1542_v42 = vsel %vm1526_vm9, %v1509_v3, %v1167_v46  ;;  %v320_v63 = vmax.f32 %v266_v14, 0.0 }
 0x1d0   : > { %v977_v2 = vpop.permute.xlu1 %976 }
 0x1d1   : > { %v883_v44 = vpop.permute.xlu0 %882  ;;  %v1477_v55 = vsel %vm1460_vm7, %v1444_v39, %v977_v2  ;;  %v268_v39 = vld [vmem:[%s2451_s19 + $0x1a0] sm:$0xff] }
 0x1d2   : > { %1280 = vrot.lane.b32.xlu1 %v4329_v13, %s2406_s10  ;;  %v1445_v24 = vsel %vm1427_vm6, %v1412_v58, %v883_v44 }
 0x1d3   : > { %1186 = vrot.lane.b32.xlu0 %v4330_v26, %s2405_s9 }
 0x1d4   : > { %v979_v8 = vpop.permute.xlu1 %978 }
 0x1d5   : > { %v1263_v17 = vpop.permute.xlu0 %1262  ;;  %v1478_v1 = vsel %vm1460_vm7, %v1445_v24, %v979_v8 }
 0x1d6   : > { %v1575_v62 = vsel %vm1559_vm10, %v1542_v42, %v1263_v17  ;;  %996 = vrot.lane.b32.xlu1 %v4329_v13, %s2403_s28 }
 0x1d7   : > { %902 = vrot.lane.b32.xlu0 %v4330_v26, %s2402_s23  ;;  %2302 = vmatmul.mubr.msk.f32.gmra.mrb[14].mxu0 %vm1597_vm11, %v1575_v62 }
 0x1d8   : > { %v789_v49 = vpop.permute.xlu1 %788 }
 0x1d9   : > { %v1073_v9 = vpop.permute.xlu0 %1072  ;;  %v1413_v15 = vsel %vm1394_vm5, %v3306_v28, %v789_v49  ;;  %v540_v28 = vrot.slane %v320_v63, 1 }
 0x1da   : > { %998 = vrot.lane.b32.xlu1 %v4331_v7, %s2403_s28  ;;  %v1510_v20 = vsel %vm1493_vm8, %v1477_v55, %v1073_v9  ;;  %v269_v55 = vld [vmem:[%s2451_s19 + $0x1a8] sm:$0x3] }
 0x1db   : > { %1282 = vrot.lane.b32.xlu0 %v4331_v7, %s2406_s10 }
 0x1dc   : > { %v1169_v23 = vpop.permute.xlu1 %1168 }
 0x1dd   : > { %v1075_v10 = vpop.permute.xlu0 %1074 }
 0x1de   : > { %808 = vrot.lane.b32.xlu1 %v2801_v41, %s2401_s22  ;;  %v1511_v61 = vsel %vm1493_vm8, %v1478_v1, %v1075_v10  ;;  %v545_v10 = vrot.slane %v320_v63, 2 }
 0x1df   : > { %1092 = vrot.lane.b32.xlu0 %v2801_v41, %s2404_s6  ;;  %v1543_v41 = vsel %vm1526_vm9, %v1510_v20, %v1169_v23 }
 0x1e0   : > { %v885_v40 = vpop.permute.xlu1 %884 }
 0x1e1   : > { %v3818_v36 = vpop.permute.xlu0 %790  ;;  %v1446_v46 = vsel %vm1427_vm6, %v1413_v15, %v885_v40 }
 0x1e2   : > { %1188 = vrot.lane.b32.xlu1 %v4332_v57, %s2405_s9  ;;  %v1414_v49 = vsel %vm1394_vm5, %v3303_v38, %v3818_v36  ;;  %v267_v38 = vld [vmem:[%s2451_s19 + $0x198] sm:$0xff] }
 0x1e3   : > { %1094 = vrot.lane.b32.xlu0 %v2794_v53, %s2404_s6 }
 0x1e4   : > { %v1265_v11 = vpop.permute.xlu1 %1264 }
 0x1e5   : > { %v1171_v22 = vpop.permute.xlu0 %1170  ;;  %v1576_v34 = vsel %vm1559_vm10, %v1543_v41, %v1265_v11  ;;  %v322_v11 = vmax.f32 %v268_v39, 0.0 }
 0x1e6   : > { %904 = vrot.lane.b32.xlu1 %v4332_v57, %s2402_s23  ;;  %2304 = vmatprep.mubr.msk.f32.mxu1 %vm1597_vm11, %v1576_v34  ;;  %v1544_v4 = vsel %vm1526_vm9, %v1511_v61, %v1171_v22  ;;  %v323_v22 = vmax.f32 %v269_v55, 0.0 }
 0x1e7   : > { %810 = vrot.lane.b32.xlu0 %v2794_v53, %s2401_s22  ;;  %v265_v53 = vld [vmem:[%s2451_s19 + $0x188] sm:$0xff]  ;;  %s2196_s19 = sshll.u32 %s4348_s12, 1 }
 0x1e8   : > { %v981_v43 = vpop.permute.xlu1 %980  ;;  %v319_v56 = vmax.f32 %v265_v53, 0.0  ;;  %v553_v24 = vrot.slane %v323_v22, 1  ;;  %v558_v45 = vrot.slane %v323_v22, 2 }
 0x1e9   : > { %v887_v54 = vpop.permute.xlu0 %886  ;;  %v1479_v25 = vsel %vm1460_vm7, %v1446_v46, %v981_v43  ;;  %v321_v43 = vmax.f32 %v267_v38, 0.0 }
 0x1ea   : > { %1284 = vrot.lane.b32.xlu1 %v4333_v60, %s2406_s10  ;;  %v538_v52 = vrot.slane %v319_v56, 1  ;;  %v543_v13 = vrot.slane %v319_v56, 2  ;;  %v1447_v7 = vsel %vm1427_vm6, %v1414_v49, %v887_v54  ;;  %v551_v54 = vrot.slane %v322_v11, 1 }
 0x1eb   : > { %1190 = vrot.lane.b32.xlu0 %v4334_v51, %s2405_s9  ;;  %v550_v1 = vrot.slane %v321_v43, 1 }
 0x1ec   : > { %v983_v47 = vpop.permute.xlu1 %982  ;;  %v539_v18 = vsel %vm372_vm0, %v537_v32, %v538_v52  ;;  %v544_v42 = vsel %vm453_vm1, %v542_v16, %v543_v13  ;;  %v541_v62 = vsel %vm372_vm0, %v538_v52, %v540_v28  ;;  %v546_v41 = vsel %vm453_vm1, %v543_v13, %v545_v10 }
 0x1ed   : > { %v1267_v50 = vpop.permute.xlu0 %1266  ;;  %v1480_v23 = vsel %vm1460_vm7, %v1447_v7, %v983_v47  ;;  %v554_v61 = vsel %vm372_vm0, %v551_v54, %v553_v24  ;;  %v556_v47 = vrot.slane %v322_v11, 2 }
 0x1ee   : > { %v1577_v31 = vsel %vm1559_vm10, %v1544_v4, %v1267_v50  ;;  %1000 = vrot.lane.b32.xlu1 %v4333_v60, %s2403_s28  ;;  %v552_v50 = vsel %vm372_vm0, %v550_v1, %v551_v54 }
 0x1ef   : > { %906 = vrot.lane.b32.xlu0 %v4334_v51, %s2402_s23  ;;  %2305 = vmatmul.mubr.msk.f32.vlgmr.msra.gmra.mrb[0].mxu1 %vm1597_vm11, %v1577_v31  ;;  %v555_v31 = vrot.slane %v321_v43, 2  ;;  %v559_v32 = vsel %vm453_vm1, %v556_v47, %v558_v45 }
 0x1f0   : > { %v3851_v6 = vpop.permute.xlu1 %792 }
 0x1f1   : > { %v1077_v33 = vpop.permute.xlu0 %1076  ;;  %v1415_v53 = vsel %vm1394_vm5, %v3322_v59, %v3851_v6  ;;  %v557_v52 = vsel %vm453_vm1, %v555_v31, %v556_v47 }
 0x1f2   : > { %1002 = vrot.lane.b32.xlu1 %v4335_v21, %s2403_s28  ;;  %v1512_v44 = vsel %vm1493_vm8, %v1479_v25, %v1077_v33 }
 0x1f3   : > { %1286 = vrot.lane.b32.xlu0 %v4335_v21, %s2406_s10 }
 0x1f4   : > { %v1173_v29 = vpop.permute.xlu1 %1172 }
 0x1f5   : > { %v1079_v27 = vpop.permute.xlu0 %1078  ;;  %v1545_v37 = vsel %vm1526_vm9, %v1512_v44, %v1173_v29 }
 0x1f6   : > { %812 = vrot.lane.b32.xlu1 %v318_v30, %s2401_s22  ;;  %v1513_v0 = vsel %vm1493_vm8, %v1480_v23, %v1079_v27 }
 0x1f7   : > { %1096 = vrot.lane.b32.xlu0 %v318_v30, %s2404_s6 }
 0x1f8   : > { %v889_v12 = vpop.permute.xlu1 %888 }
 0x1f9   : > { %v3864_v2 = vpop.permute.xlu0 %794  ;;  %v1448_v30 = vsel %vm1427_vm6, %v1415_v53, %v889_v12 }
 0x1fa   : > { %1192 = vrot.lane.b32.xlu1 %v539_v18, %s2405_s9  ;;  %v1416_v25 = vsel %vm1394_vm5, %v3319_v48, %v3864_v2 }
 0x1fb   : > { %1098 = vrot.lane.b32.xlu0 %v319_v56, %s2404_s6 }
 0x1fc   : > { %v1269_v26 = vpop.permute.xlu1 %1268 }
 0x1fd   : > { %v1578_v3 = vsel %vm1559_vm10, %v1545_v37, %v1269_v26  ;;  %v1175_v8 = vpop.permute.xlu0 %1174 }
 0x1fe   : > { %908 = vrot.lane.b32.xlu1 %v539_v18, %s2402_s23  ;;  %2307 = vmatprep.mubr.msk.f32.mxu1 %vm1597_vm11, %v1578_v3  ;;  %v1546_v57 = vsel %vm1526_vm9, %v1513_v0, %v1175_v8 }
 0x1ff   : > { %814 = vrot.lane.b32.xlu0 %v319_v56, %s2401_s22  ;;  %s212_s22 = scalar_lea.vmem %s4061_s3, %s2196_s19 }
 0x200   : > { %v985_v17 = vpop.permute.xlu1 %984 }
 0x201   : > { %v3880_v9 = vpop.permute.xlu0 %890  ;;  %v1481_v33 = vsel %vm1460_vm7, %v1448_v30, %v985_v17 }
 0x202   : > { %1288 = vrot.lane.b32.xlu1 %v544_v42, %s2406_s10  ;;  %v1449_v16 = vsel %vm1427_vm6, %v1416_v25, %v3880_v9 }
 0x203   : > { %1194 = vrot.lane.b32.xlu0 %v541_v62, %s2405_s9 }
 0x204   : > { %v987_v40 = vpop.permute.xlu1 %986 }
 0x205   : > { %v1271_v20 = vpop.permute.xlu0 %1270  ;;  %v1482_v37 = vsel %vm1460_vm7, %v1449_v16, %v987_v40 }
 0x206   : > { %v1579_v36 = vsel %vm1559_vm10, %v1546_v57, %v1271_v20  ;;  %1004 = vrot.lane.b32.xlu1 %v544_v42, %s2403_s28 }
 0x207   : > { %910 = vrot.lane.b32.xlu0 %v541_v62, %s2402_s23  ;;  %2308 = vmatmul.mubr.msk.f32.gmra.mrb[2].mxu1 %vm1597_vm11, %v1579_v36 }
 0x208   : > { %v797_v34 = vpop.permute.xlu1 %796 }
 0x209   : > { %v1081_v58 = vpop.permute.xlu0 %1080  ;;  %v1417_v49 = vsel %vm1394_vm5, %v3338_v19, %v797_v34 }
 0x20a   : > { %1006 = vrot.lane.b32.xlu1 %v546_v41, %s2403_s28  ;;  %v1514_v21 = vsel %vm1493_vm8, %v1481_v33, %v1081_v58 }
 0x20b   : > { %1290 = vrot.lane.b32.xlu0 %v546_v41, %s2406_s10 }
 0x20c   : > { %v1177_v60 = vpop.permute.xlu1 %1176 }
 0x20d   : > { %v1083_v51 = vpop.permute.xlu0 %1082  ;;  %v1547_v59 = vsel %vm1526_vm9, %v1514_v21, %v1177_v60 }
 0x20e   : > { %1102 = vrot.lane.b32.xlu1 %v322_v11, %s2404_s6  ;;  %v1515_v26 = vsel %vm1493_vm8, %v1482_v37, %v1083_v51 }
 0x20f   : > { %1100 = vrot.lane.b32.xlu0 %v321_v43, %s2404_s6 }
 0x210   : > { %v893_v4 = vpop.permute.xlu1 %892 }
 0x211   : > { %v799_v56 = vpop.permute.xlu0 %798  ;;  %v1450_v7 = vsel %vm1427_vm6, %v1417_v49, %v893_v4 }
 0x212   : > { %1198 = vrot.lane.b32.xlu1 %v554_v61, %s2405_s9  ;;  %v1418_v58 = vsel %vm1394_vm5, %v3335_v5, %v799_v56 }
 0x213   : > { %1196 = vrot.lane.b32.xlu0 %v552_v50, %s2405_s9 }
 0x214   : > { %v1273_v6 = vpop.permute.xlu1 %1272 }
 0x215   : > { %v1580_v29 = vsel %vm1559_vm10, %v1547_v59, %v1273_v6  ;;  %v1179_v27 = vpop.permute.xlu0 %1178 }
 0x216   : > { %v2282_v14 = vpop.f32.mrb[0].mxu0  ;;  %1294 = vrot.lane.b32.xlu1 %v559_v32, %s2406_s10  ;;  %2310 = vmatprep.mubr.msk.f32.mxu1 %vm1597_vm11, %v1580_v29  ;;  %v1548_v3 = vsel %vm1526_vm9, %v1515_v26, %v1179_v27 }
 0x217   : > { %1924 = vst [vmem:[%s3916_s18 + $0x8] sm:$0xff] %v2282_v14  ;;  %v1993_v18 = vmul.f32 %v2282_v14, %v2282_v14  ;;  %v1764_v15 = vpop.f32.mrb[1].mxu0  ;;  %1292 = vrot.lane.b32.xlu0 %v557_v52, %s2406_s10 }
 0x218   : > { %1923 = vst [vmem:[%s3916_s18] sm:$0xff] %v1764_v15  ;;  %v1955_v12 = vadd.f32 %v2282_v14, %v1764_v15  ;;  %v1992_v63 = vmul.f32 %v1764_v15, %v1764_v15  ;;  %v989_v46 = vpop.permute.xlu1 %988 }
 0x219   : > { %v895_v44 = vpop.permute.xlu0 %894  ;;  %v1483_v10 = vsel %vm1460_vm7, %v1450_v7, %v989_v46 }
 0x21a   : > { %v2024_v13 = vadd.f32 %v1993_v18, %v1992_v63  ;;  %v1451_v24 = vsel %vm1427_vm6, %v1418_v58, %v895_v44  ;;  %v4336_v44 = vld [vmem:[#allocation10_spill] sm:$0xff] }
 0x21c   : > { %v991_v28 = vpop.permute.xlu1 %990 }
 0x21d   : > { %v1275_v8 = vpop.permute.xlu0 %1274  ;;  %v1484_v60 = vsel %vm1460_vm7, %v1451_v24, %v991_v28  ;;  %v4338_v24 = vld [vmem:[#allocation13_spill] sm:$0xff] }
 0x21e   : > { %v1581_v42 = vsel %vm1559_vm10, %v1548_v3, %v1275_v8 }
 0x21f   : > { %2311 = vmatmul.mubr.msk.f32.gmra.mrb[4].mxu1 %vm1597_vm11, %v1581_v42 }
 0x220   : > { %v801_v48 = vpop.permute.xlu1 %800 }
 0x221   : > { %v1085_v2 = vpop.permute.xlu0 %1084  ;;  %v1419_v56 = vsel %vm1394_vm5, %v3354_v35, %v801_v48 }
 0x222   : > { %v1516_v40 = vsel %vm1493_vm8, %v1483_v10, %v1085_v2 }
 0x224   : > { %v1181_v17 = vpop.permute.xlu1 %1180 }
 0x225   : > { %v1087_v62 = vpop.permute.xlu0 %1086  ;;  %v1549_v55 = vsel %vm1526_vm9, %v1516_v40, %v1181_v17 }
 0x226   : > { %v1517_v1 = vsel %vm1493_vm8, %v1484_v60, %v1087_v62 }
 0x228   : > { %v897_v9 = vpop.permute.xlu1 %896 }
 0x229   : > { %v803_v23 = vpop.permute.xlu0 %802  ;;  %v1452_v59 = vsel %vm1427_vm6, %v1419_v56, %v897_v9 }
 0x22a   : > { %v2285_v0 = vpop.f32.mrb[2].mxu0  ;;  %v1420_v16 = vsel %vm1394_vm5, %v4336_v44, %v803_v23 }
 0x22b   : > { %1926 = vst [vmem:[%s3916_s18 + $0x18] sm:$0xff] %v2285_v0  ;;  %v1774_v39 = vpop.f32.mrb[3].mxu0  ;;  %v1995_v41 = vmul.f32 %v2285_v0, %v2285_v0 }
 0x22c   : > { %1925 = vst [vmem:[%s3916_s18 + $0x10] sm:$0xff] %v1774_v39  ;;  %v1956_v57 = vadd.f32 %v1955_v12, %v1774_v39  ;;  %v1994_v20 = vmul.f32 %v1774_v39, %v1774_v39  ;;  %v1277_v38 = vpop.permute.xlu1 %1276 }
 0x22d   : > { %v1582_v36 = vsel %vm1559_vm10, %v1549_v55, %v1277_v38  ;;  %v1183_v19 = vpop.permute.xlu0 %1182  ;;  %v4337_v55 = vld [vmem:[#allocation12_spill] sm:$0xff] }
 0x22e   : > { %v2025_v11 = vadd.f32 %v2024_v13, %v1994_v20  ;;  %2313 = vmatprep.mubr.msk.f32.mxu1 %vm1597_vm11, %v1582_v36  ;;  %v1957_v22 = vadd.f32 %v2285_v0, %v1956_v57  ;;  %v1550_v61 = vsel %vm1526_vm9, %v1517_v1, %v1183_v19 }
 0x230   : > { %v993_v34 = vpop.permute.xlu1 %992  ;;  %v2026_v43 = vadd.f32 %v2025_v11, %v1995_v41 }
 0x231   : > { %v899_v54 = vpop.permute.xlu0 %898  ;;  %v1485_v52 = vsel %vm1460_vm7, %v1452_v59, %v993_v34 }
 0x232   : > { %v1453_v37 = vsel %vm1427_vm6, %v1420_v16, %v899_v54 }
 0x234   : > { %v995_v51 = vpop.permute.xlu1 %994 }
 0x235   : > { %v1279_v47 = vpop.permute.xlu0 %1278  ;;  %v1486_v26 = vsel %vm1460_vm7, %v1453_v37, %v995_v51 }
 0x236   : > { %v1583_v45 = vsel %vm1559_vm10, %v1550_v61, %v1279_v47 }
 0x237   : > { %2314 = vmatmul.mubr.msk.f32.gmra.mrb[6].mxu1 %vm1597_vm11, %v1583_v45 }
 0x238   : > { %v805_v53 = vpop.permute.xlu1 %804 }
 0x239   : > { %v1089_v4 = vpop.permute.xlu0 %1088  ;;  %v1421_v57 = vsel %vm1394_vm5, %v4337_v55, %v805_v53 }
 0x23a   : > { %v1518_v18 = vsel %vm1493_vm8, %v1485_v52, %v1089_v4 }
 0x23c   : > { %v1185_v50 = vpop.permute.xlu1 %1184 }
 0x23d   : > { %v1091_v5 = vpop.permute.xlu0 %1090  ;;  %v1551_v15 = vsel %vm1526_vm9, %v1518_v18, %v1185_v50 }
 0x23e   : > { %v2288_v31 = vpop.f32.mrb[4].mxu0  ;;  %v1519_v28 = vsel %vm1493_vm8, %v1486_v26, %v1091_v5  ;;  %v4340_v26 = vld [vmem:[#allocation15_spill] sm:$0xff] }
 0x23f   : > { %1928 = vst [vmem:[%s3916_s18 + $0x28] sm:$0xff] %v2288_v31  ;;  %v1784_v30 = vpop.f32.mrb[5].mxu0  ;;  %v1997_v29 = vmul.f32 %v2288_v31, %v2288_v31 }
 0x240   : > { %1927 = vst [vmem:[%s3916_s18 + $0x20] sm:$0xff] %v1784_v30  ;;  %v1958_v33 = vadd.f32 %v1957_v22, %v1784_v30  ;;  %v1996_v21 = vmul.f32 %v1784_v30, %v1784_v30  ;;  %v901_v32 = vpop.permute.xlu1 %900 }
 0x241   : > { %v807_v6 = vpop.permute.xlu0 %806  ;;  %v1454_v36 = vsel %vm1427_vm6, %v1421_v57, %v901_v32 }
 0x242   : > { %v2027_v27 = vadd.f32 %v2026_v43, %v1996_v21  ;;  %v1959_v14 = vadd.f32 %v2288_v31, %v1958_v33  ;;  %v1422_v60 = vsel %vm1394_vm5, %v4338_v24, %v807_v6 }
 0x244   : > { %v1281_v12 = vpop.permute.xlu1 %1280  ;;  %v2028_v63 = vadd.f32 %v2027_v27, %v1997_v29 }
 0x245   : > { %v1584_v35 = vsel %vm1559_vm10, %v1551_v15, %v1281_v12  ;;  %v1187_v46 = vpop.permute.xlu0 %1186 }
 0x246   : > { %2316 = vmatprep.mubr.msk.f32.mxu1 %vm1597_vm11, %v1584_v35  ;;  %v1552_v8 = vsel %vm1526_vm9, %v1519_v28, %v1187_v46 }
 0x248   : > { %v997_v25 = vpop.permute.xlu1 %996 }
 0x249   : > { %v903_v13 = vpop.permute.xlu0 %902  ;;  %v1487_v41 = vsel %vm1460_vm7, %v1454_v36, %v997_v25 }
 0x24a   : > { %v1455_v51 = vsel %vm1427_vm6, %v1422_v60, %v903_v13 }
 0x24c   : > { %v999_v3 = vpop.permute.xlu1 %998 }
 0x24d   : > { %v1283_v42 = vpop.permute.xlu0 %1282  ;;  %v1488_v61 = vsel %vm1460_vm7, %v1455_v51, %v999_v3 }
 0x24e   : > { %v1585_v48 = vsel %vm1559_vm10, %v1552_v8, %v1283_v42 }
 0x24f   : > { %2317 = vmatmul.mubr.msk.f32.gmra.mrb[8].mxu1 %vm1597_vm11, %v1585_v48 }
 0x250   : > { %v809_v2 = vpop.permute.xlu1 %808 }
 0x251   : > { %v1093_v17 = vpop.permute.xlu0 %1092 }
 0x252   : > { %v2291_v62 = vpop.f32.mrb[6].mxu0  ;;  %v1520_v11 = vsel %vm1493_vm8, %v1487_v41, %v1093_v17  ;;  %v4342_v41 = vld [vmem:[#allocation68_spill] sm:$0xff] }
 0x253   : > { %1930 = vst [vmem:[%s3916_s18 + $0x38] sm:$0xff] %v2291_v62  ;;  %v1794_v49 = vpop.f32.mrb[7].mxu0  ;;  %v1999_v0 = vmul.f32 %v2291_v62, %v2291_v62 }
 0x254   : > { %1929 = vst [vmem:[%s3916_s18 + $0x30] sm:$0xff] %v1794_v49  ;;  %v1960_v9 = vadd.f32 %v1959_v14, %v1794_v49  ;;  %v1998_v7 = vmul.f32 %v1794_v49, %v1794_v49  ;;  %v1189_v23 = vpop.permute.xlu1 %1188  ;;  %v4339_v14 = vld [vmem:[#allocation14_spill] sm:$0xff] }
 0x255   : > { %v1095_v10 = vpop.permute.xlu0 %1094  ;;  %v1553_v22 = vsel %vm1526_vm9, %v1520_v11, %v1189_v23  ;;  %v1423_v18 = vsel %vm1394_vm5, %v4339_v14, %v809_v2 }
 0x256   : > { %v2029_v40 = vadd.f32 %v2028_v63, %v1998_v7  ;;  %v1961_v39 = vadd.f32 %v2291_v62, %v1960_v9  ;;  %v1521_v47 = vsel %vm1493_vm8, %v1488_v61, %v1095_v10 }
 0x258   : > { %v905_v20 = vpop.permute.xlu1 %904  ;;  %v2030_v38 = vadd.f32 %v2029_v40, %v1999_v0 }
 0x259   : > { %v811_v19 = vpop.permute.xlu0 %810  ;;  %v1456_v12 = vsel %vm1427_vm6, %v1423_v18, %v905_v20 }
 0x25a   : > { %v1424_v28 = vsel %vm1394_vm5, %v4340_v26, %v811_v19 }
 0x25c   : > { %v1285_v34 = vpop.permute.xlu1 %1284 }
 0x25d   : > { %v1586_v43 = vsel %vm1559_vm10, %v1553_v22, %v1285_v34  ;;  %v1191_v58 = vpop.permute.xlu0 %1190 }
 0x25e   : > { %2319 = vmatprep.mubr.msk.f32.mxu1 %vm1597_vm11, %v1586_v43  ;;  %v1554_v53 = vsel %vm1526_vm9, %v1521_v47, %v1191_v58 }
 0x260   : > { %v1001_v54 = vpop.permute.xlu1 %1000 }
 0x261   : > { %v907_v1 = vpop.permute.xlu0 %906  ;;  %v1489_v35 = vsel %vm1460_vm7, %v1456_v12, %v1001_v54 }
 0x262   : > { %v1457_v8 = vsel %vm1427_vm6, %v1424_v28, %v907_v1 }
 0x264   : > { %v1003_v45 = vpop.permute.xlu1 %1002 }
 0x265   : > { %v1287_v4 = vpop.permute.xlu0 %1286  ;;  %v1490_v48 = vsel %vm1460_vm7, %v1457_v8, %v1003_v45 }
 0x266   : > { %v1587_v50 = vsel %vm1559_vm10, %v1554_v53, %v1287_v4  ;;  %v2294_v5 = vpop.f32.mrb[8].mxu0 }
 0x267   : > { %1932 = vst [vmem:[%s3916_s18 + $0x48] sm:$0xff] %v2294_v5  ;;  %v1804_v31 = vpop.f32.mrb[9].mxu0  ;;  %2320 = vmatmul.mubr.msk.f32.gmra.mrb[10].mxu1 %vm1597_vm11, %v1587_v50  ;;  %v2001_v32 = vmul.f32 %v2294_v5, %v2294_v5 }
 0x268   : > { %1931 = vst [vmem:[%s3916_s18 + $0x40] sm:$0xff] %v1804_v31  ;;  %v1962_v30 = vadd.f32 %v1961_v39, %v1804_v31  ;;  %v2000_v56 = vmul.f32 %v1804_v31, %v1804_v31  ;;  %v813_v33 = vpop.permute.xlu1 %812 }
 0x269   : > { %v1097_v21 = vpop.permute.xlu0 %1096  ;;  %v1425_v11 = vsel %vm1394_vm5, %v4342_v41, %v813_v33 }
 0x26a   : > { %v2031_v59 = vadd.f32 %v2030_v38, %v2000_v56  ;;  %v1963_v6 = vadd.f32 %v2294_v5, %v1962_v30  ;;  %v1522_v46 = vsel %vm1493_vm8, %v1489_v35, %v1097_v21  ;;  %v4341_v38 = vld [vmem:[#allocation67_spill] sm:$0xff] }
 0x26c   : > { %v1193_v52 = vpop.permute.xlu1 %1192  ;;  %v2032_v29 = vadd.f32 %v2031_v59, %v2001_v32 }
 0x26d   : > { %v1099_v27 = vpop.permute.xlu0 %1098  ;;  %v1555_v25 = vsel %vm1526_vm9, %v1522_v46, %v1193_v52 }
 0x26e   : > { %v1523_v17 = vsel %vm1493_vm8, %v1490_v48, %v1099_v27 }
 0x270   : > { %v909_v15 = vpop.permute.xlu1 %908 }
 0x271   : > { %v815_v63 = vpop.permute.xlu0 %814  ;;  %v1458_v43 = vsel %vm1427_vm6, %v1425_v11, %v909_v15 }
 0x272   : > { %v1426_v36 = vsel %vm1394_vm5, %v4341_v38, %v815_v63 }
 0x274   : > { %v1289_v44 = vpop.permute.xlu1 %1288 }
 0x275   : > { %v1588_v16 = vsel %vm1559_vm10, %v1555_v25, %v1289_v44  ;;  %v1195_v13 = vpop.permute.xlu0 %1194 }
 0x276   : > { %2322 = vmatprep.mubr.msk.f32.mxu1 %vm1597_vm11, %v1588_v16  ;;  %v1556_v7 = vsel %vm1526_vm9, %v1523_v17, %v1195_v13 }
 0x278   : > { %v1005_v37 = vpop.permute.xlu1 %1004 }
 0x279   : > { %v911_v3 = vpop.permute.xlu0 %910  ;;  %v1491_v54 = vsel %vm1460_vm7, %v1458_v43, %v1005_v37 }
 0x27a   : > { %v2297_v42 = vpop.f32.mrb[10].mxu0  ;;  %v1459_v22 = vsel %vm1427_vm6, %v1426_v36, %v911_v3 }
 0x27b   : > { %1934 = vst [vmem:[%s3916_s18 + $0x58] sm:$0xff] %v2297_v42  ;;  %v1814_v2 = vpop.f32.mrb[11].mxu0  ;;  %v2003_v10 = vmul.f32 %v2297_v42, %v2297_v42 }
 0x27c   : > { %1933 = vst [vmem:[%s3916_s18 + $0x50] sm:$0xff] %v1814_v2  ;;  %v1964_v62 = vadd.f32 %v1963_v6, %v1814_v2  ;;  %v2002_v49 = vmul.f32 %v1814_v2, %v1814_v2  ;;  %v1007_v9 = vpop.permute.xlu1 %1006 }
 0x27d   : > { %v1291_v23 = vpop.permute.xlu0 %1290  ;;  %v1492_v58 = vsel %vm1460_vm7, %v1459_v22, %v1007_v9 }
 0x27e   : > { %v2033_v0 = vadd.f32 %v2032_v29, %v2002_v49  ;;  %v1589_v40 = vsel %vm1559_vm10, %v1556_v7, %v1291_v23  ;;  %v1965_v39 = vadd.f32 %v2297_v42, %v1964_v62 }
 0x27f   : > { %2323 = vmatmul.mubr.msk.f32.gmra.mrb[12].mxu1 %vm1597_vm11, %v1589_v40 }
 0x280   : > { %v1103_v55 = vpop.permute.xlu1 %1102  ;;  %v2034_v57 = vadd.f32 %v2033_v0, %v2003_v10 }
 0x281   : > { %v1101_v20 = vpop.permute.xlu0 %1100  ;;  %v1525_v24 = vsel %vm1493_vm8, %v1492_v58, %v1103_v55 }
 0x282   : > { %v1524_v60 = vsel %vm1493_vm8, %v1491_v54, %v1101_v20 }
 0x284   : > { %v1199_v19 = vpop.permute.xlu1 %1198 }
 0x285   : > { %v1197_v34 = vpop.permute.xlu0 %1196  ;;  %v1558_v1 = vsel %vm1526_vm9, %v1525_v24, %v1199_v19 }
 0x286   : > { %v1557_v61 = vsel %vm1526_vm9, %v1524_v60, %v1197_v34 }
 0x288   : > { %v1295_v51 = vpop.permute.xlu1 %1294 }
 0x289   : > { %v1591_v47 = vsel %vm1559_vm10, %v1558_v1, %v1295_v51  ;;  %v1293_v45 = vpop.permute.xlu0 %1292 }
 0x28a   : > { %v1590_v53 = vsel %vm1559_vm10, %v1557_v61, %v1293_v45 }
 0x28b   : > { %2325 = vmatprep.mubr.msk.f32.mxu1 %vm1597_vm11, %v1590_v53 }
 0x28c   : > { %2326 = vmatmul.mubr.msk.f32.gmra.mrb[14].mxu1 %vm1597_vm11, %v1591_v47 }
 0x292   : > { %v2300_v4 = vpop.f32.mrb[12].mxu0 }
 0x293   : > { %1936 = vst [vmem:[%s3916_s18 + $0x68] sm:$0xff] %v2300_v4  ;;  %v1824_v50 = vpop.f32.mrb[13].mxu0  ;;  %v2005_v30 = vmul.f32 %v2300_v4, %v2300_v4 }
 0x294   : > { %1935 = vst [vmem:[%s3916_s18 + $0x60] sm:$0xff] %v1824_v50  ;;  %v1966_v5 = vadd.f32 %v1965_v39, %v1824_v50  ;;  %v2004_v31 = vmul.f32 %v1824_v50, %v1824_v50 }
 0x296   : > { %v2035_v56 = vadd.f32 %v2034_v57, %v2004_v31  ;;  %v1967_v33 = vadd.f32 %v2300_v4, %v1966_v5 }
 0x298   : > { %v2036_v21 = vadd.f32 %v2035_v56, %v2005_v30 }
 0x2aa   : > { %v2303_v32 = vpop.f32.mrb[14].mxu0 }
 0x2ab   : > { %1938 = vst [vmem:[%s3916_s18 + $0x78] sm:$0xff] %v2303_v32  ;;  %v1834_v59 = vpop.f32.mrb[15].mxu0  ;;  %v2007_v29 = vmul.f32 %v2303_v32, %v2303_v32 }
 0x2ac   : > { %1937 = vst [vmem:[%s3916_s18 + $0x70] sm:$0xff] %v1834_v59  ;;  %v1968_v6 = vadd.f32 %v1967_v33, %v1834_v59  ;;  %v2006_v52 = vmul.f32 %v1834_v59, %v1834_v59 }
 0x2ae   : > { %v1969_v27 = vadd.f32 %v2303_v32, %v1968_v6  ;;  %v2037_v14 = vadd.f32 %v2036_v21, %v2006_v52 }
 0x2b0   : > { %v2038_v18 = vadd.f32 %v2037_v14, %v2007_v29 }
 0x2c2   : > { %v2306_v15 = vpop.f32.mrb[0].mxu1 }
 0x2c3   : > { %1940 = vst [vmem:[%s3916_s18 + $0x88] sm:$0xff] %v2306_v15  ;;  %v1844_v12 = vpop.f32.mrb[1].mxu1  ;;  %v2009_v46 = vmul.f32 %v2306_v15, %v2306_v15 }
 0x2c4   : > { %1939 = vst [vmem:[%s3916_s18 + $0x80] sm:$0xff] %v1844_v12  ;;  %v1970_v63 = vadd.f32 %v1969_v27, %v1844_v12  ;;  %v2008_v35 = vmul.f32 %v1844_v12, %v1844_v12 }
 0x2c6   : > { %v2039_v25 = vadd.f32 %v2038_v18, %v2008_v35  ;;  %v1971_v44 = vadd.f32 %v2306_v15, %v1970_v63 }
 0x2c8   : > { %v2040_v16 = vadd.f32 %v2039_v25, %v2009_v46 }
 0x2da   : > { %v2309_v13 = vpop.f32.mrb[2].mxu1 }
 0x2db   : > { %1942 = vst [vmem:[%s3916_s18 + $0x98] sm:$0xff] %v2309_v13  ;;  %v1854_v37 = vpop.f32.mrb[3].mxu1  ;;  %v2011_v3 = vmul.f32 %v2309_v13, %v2309_v13 }
 0x2dc   : > { %1941 = vst [vmem:[%s3916_s18 + $0x90] sm:$0xff] %v1854_v37  ;;  %v1972_v26 = vadd.f32 %v1971_v44, %v1854_v37  ;;  %v2010_v28 = vmul.f32 %v1854_v37, %v1854_v37 }
 0x2de   : > { %v2041_v8 = vadd.f32 %v2040_v16, %v2010_v28  ;;  %v1973_v42 = vadd.f32 %v2309_v13, %v1972_v26 }
 0x2e0   : > { %v2042_v48 = vadd.f32 %v2041_v8, %v2011_v3 }
 0x2f2   : > { %v2312_v2 = vpop.f32.mrb[4].mxu1 }
 0x2f3   : > { %1944 = vst [vmem:[%s3916_s18 + $0xa8] sm:$0xff] %v2312_v2  ;;  %v1864_v17 = vpop.f32.mrb[5].mxu1  ;;  %v2013_v9 = vmul.f32 %v2312_v2, %v2312_v2 }
 0x2f4   : > { %1943 = vst [vmem:[%s3916_s18 + $0xa0] sm:$0xff] %v1864_v17  ;;  %v1974_v62 = vadd.f32 %v1973_v42, %v1864_v17  ;;  %v2012_v49 = vmul.f32 %v1864_v17, %v1864_v17 }
 0x2f6   : > { %v2043_v7 = vadd.f32 %v2042_v48, %v2012_v49  ;;  %v1975_v23 = vadd.f32 %v2312_v2, %v1974_v62 }
 0x2f8   : > { %v2044_v10 = vadd.f32 %v2043_v7, %v2013_v9 }
 0x30a   : > { %v2315_v0 = vpop.f32.mrb[6].mxu1 }
 0x30b   : > { %1946 = vst [vmem:[%s3916_s18 + $0xb8] sm:$0xff] %v2315_v0  ;;  %v1874_v40 = vpop.f32.mrb[7].mxu1  ;;  %v2015_v57 = vmul.f32 %v2315_v0, %v2315_v0 }
 0x30c   : > { %1945 = vst [vmem:[%s3916_s18 + $0xb0] sm:$0xff] %v1874_v40  ;;  %v1976_v39 = vadd.f32 %v1975_v23, %v1874_v40  ;;  %v2014_v55 = vmul.f32 %v1874_v40, %v1874_v40 }
 0x30e   : > { %v2045_v20 = vadd.f32 %v2044_v10, %v2014_v55  ;;  %v1977_v38 = vadd.f32 %v2315_v0, %v1976_v39 }
 0x310   : > { %v2046_v36 = vadd.f32 %v2045_v20, %v2015_v57 }
 0x322   : > { %v2318_v19 = vpop.f32.mrb[8].mxu1 }
 0x323   : > { %1948 = vst [vmem:[%s3916_s18 + $0xc8] sm:$0xff] %v2318_v19  ;;  %v1884_v41 = vpop.f32.mrb[9].mxu1  ;;  %v2017_v34 = vmul.f32 %v2318_v19, %v2318_v19 }
 0x324   : > { %1947 = vst [vmem:[%s3916_s18 + $0xc0] sm:$0xff] %v1884_v41  ;;  %v1978_v11 = vadd.f32 %v1977_v38, %v1884_v41  ;;  %v2016_v22 = vmul.f32 %v1884_v41, %v1884_v41 }
 0x326   : > { %v2047_v43 = vadd.f32 %v2046_v36, %v2016_v22  ;;  %v1979_v58 = vadd.f32 %v2318_v19, %v1978_v11 }
 0x328   : > { %v2048_v54 = vadd.f32 %v2047_v43, %v2017_v34 }
 0x33a   : > { %v2321_v24 = vpop.f32.mrb[10].mxu1 }
 0x33b   : > { %1950 = vst [vmem:[%s3916_s18 + $0xd8] sm:$0xff] %v2321_v24  ;;  %v1894_v60 = vpop.f32.mrb[11].mxu1  ;;  %v2019_v61 = vmul.f32 %v2321_v24, %v2321_v24 }
 0x33c   : > { %1949 = vst [vmem:[%s3916_s18 + $0xd0] sm:$0xff] %v1894_v60  ;;  %v1980_v1 = vadd.f32 %v1979_v58, %v1894_v60  ;;  %v2018_v51 = vmul.f32 %v1894_v60, %v1894_v60 }
 0x33e   : > { %v2049_v47 = vadd.f32 %v2048_v54, %v2018_v51  ;;  %v1981_v45 = vadd.f32 %v2321_v24, %v1980_v1 }
 0x340   : > { %v2050_v53 = vadd.f32 %v2049_v47, %v2019_v61 }
 0x352   : > { %v2324_v4 = vpop.f32.mrb[12].mxu1 }
 0x353   : > { %1952 = vst [vmem:[%s3916_s18 + $0xe8] sm:$0xff] %v2324_v4  ;;  %v1904_v50 = vpop.f32.mrb[13].mxu1  ;;  %v2021_v30 = vmul.f32 %v2324_v4, %v2324_v4 }
 0x354   : > { %1951 = vst [vmem:[%s3916_s18 + $0xe0] sm:$0xff] %v1904_v50  ;;  %v1982_v5 = vadd.f32 %v1981_v45, %v1904_v50  ;;  %v2020_v31 = vmul.f32 %v1904_v50, %v1904_v50 }
 0x356   : > { %v2051_v56 = vadd.f32 %v2050_v53, %v2020_v31  ;;  %v1983_v33 = vadd.f32 %v2324_v4, %v1982_v5 }
 0x358   : > { %v2052_v21 = vadd.f32 %v2051_v56, %v2021_v30 }
 0x35f   : > { %v2327_v32 = vpop.f32.mrb[14].mxu1 }
 0x360   : > { %1954 = vst [vmem:[%s3916_s18 + $0xf8] sm:$0xff] %v2327_v32  ;;  %v1914_v59 = vpop.f32.mrb[15].mxu1  ;;  %v2023_v29 = vmul.f32 %v2327_v32, %v2327_v32 }
 0x361   : > { %1953 = vst [vmem:[%s3916_s18 + $0xf0] sm:$0xff] %v1914_v59  ;;  %v1984_v6 = vadd.f32 %v1983_v33, %v1914_v59  ;;  %v2022_v52 = vmul.f32 %v1914_v59, %v1914_v59 }
 0x363   : > { %v1985_v27 = vadd.f32 %v2327_v32, %v1984_v6  ;;  %v2053_v14 = vadd.f32 %v2052_v21, %v2022_v52 }
 0x365   : > { %v1986_v18 = vrot.slane %v1985_v27, 4  ;;  %v2054_v15 = vadd.f32 %v2053_v14, %v2023_v29 }
 0x367   : > { %v1987_v12 = vadd.f32 %v1986_v18, %v1985_v27  ;;  %v2055_v63 = vrot.slane %v2054_v15, 4 }
 0x369   : > { %v1988_v35 = vrot.slane %v1987_v12, 2  ;;  %v2056_v46 = vadd.f32 %v2055_v63, %v2054_v15 }
 0x36b   : > { %v1989_v25 = vadd.f32 %v1988_v35, %v1987_v12  ;;  %v2057_v44 = vrot.slane %v2056_v46, 2 }
 0x36d   : > { %v1990_v16 = vrot.slane %v1989_v25, 1  ;;  %v2058_v13 = vadd.f32 %v2057_v44, %v2056_v46 }
 0x36f   : > { %v2059_v37 = vrot.slane %v2058_v13, 1  ;;  %v1991_v26 = vadd.f32 %v1990_v16, %v1989_v25 }
 0x371   : > { %v2060_v28 = vadd.f32 %v2059_v37, %v2058_v13 }
 0x373   : > { %v2062_v3 = vsel %vm2061_vm12, %v1991_v26, %v2060_v28 }
 0x374   : > { %2063 = vst [vmem:[%s212_s22] sm:$0x3] %v2062_v3 }
 0x375 PF: > { %s14_s14 = sadd.s32 1, %s2397_s14   ;;  %s4343_s12 = smov %s2393_s13 }
 0x376   : > { %p11_p5 = scmp.ge.s32.totalorder %s14_s14, 4   ;;  %s4344_s13 = smov %s4346_s15 }
 0x378   :  { %13 = sbr.rel (!%p11_p5) target bundleno = 2 (0x2), region = 71 }

</bundles_post_ra>
